<compile_context>
chip_gen: v6e
topology: v6e:2x2x1
jax: 0.10.0
libtpu: 0.0.40
codegen_flags: <defaults>
</compile_context>

<pallas_src>
import functools
import math

import jax
import jax.numpy as jnp
from jax.experimental import pallas as pl
from jax.experimental.pallas import tpu as pltpu

ACTION_SIZE = 5
NUM_HEADS = 6

VMEM_SPEC = pl.BlockSpec(memory_space=pltpu.MemorySpace.VMEM)


# ----------------------------------------------------------------------------
# Pallas kernels
# ----------------------------------------------------------------------------
def _conv_mm_kernel(cols_ref, w_ref, b_ref, out_ref):
    # cols block: (1, M, K); w: (K, OC); b: (1, OC); out block: (1, M, OC)
    y = jnp.dot(cols_ref[0], w_ref[...], preferred_element_type=jnp.float32)
    y = y + b_ref[...]
    out_ref[0] = jnp.maximum(y, 0.0)           # fused ReLU


def pallas_conv_matmul(cols, w_t, b2):
    """cols: (B, M, K); w_t: (K, OC); b2: (1, OC) -> (B, M, OC) with ReLU."""
    B, M, K = cols.shape
    OC = w_t.shape[1]
    return pl.pallas_call(
        _conv_mm_kernel,
        out_shape=jax.ShapeDtypeStruct((B, M, OC), jnp.float32),
        grid=(B,),
        in_specs=[pl.BlockSpec((1, M, K), lambda i: (i, 0, 0)),
                  pl.BlockSpec((K, OC), lambda i: (0, 0)),
                  pl.BlockSpec((1, OC), lambda i: (0, 0))],
        out_specs=pl.BlockSpec((1, M, OC), lambda i: (i, 0, 0)),
        compiler_params=pltpu.CompilerParams(
            dimension_semantics=("parallel",)),
    )(cols, w_t, b2)


def _fused_head_kernel(conv_ref, nrgb_ref, h_ref, c_ref,
                       w1a_ref, w1b_ref, b1_ref,
                       wih_ref, whh_ref, blstm_ref,
                       wa_ref, ba_ref, wc_ref, bc_ref,
                       pol_ref, v_ref, h_out_ref, c_out_ref):
    # ---- fc1 (split contraction: conv part + non_rgb part, no concat) ----
    x = (jnp.dot(conv_ref[...], w1a_ref[...], preferred_element_type=jnp.float32)
         + jnp.dot(nrgb_ref[...], w1b_ref[...], preferred_element_type=jnp.float32)
         + b1_ref[...])

    # ---- LSTMCell (PyTorch gate order: i, f, g, o) ----
    gates = (jnp.dot(x, wih_ref[...], preferred_element_type=jnp.float32)
             + jnp.dot(h_ref[...], whh_ref[...], preferred_element_type=jnp.float32)
             + blstm_ref[...])
    H = h_ref.shape[1]
    i = jax.nn.sigmoid(gates[:, 0 * H:1 * H])
    f = jax.nn.sigmoid(gates[:, 1 * H:2 * H])
    g = jnp.tanh(gates[:, 2 * H:3 * H])
    o = jax.nn.sigmoid(gates[:, 3 * H:4 * H])
    c_new = f * c_ref[...] + i * g
    h_new = o * jnp.tanh(c_new)
    c_out_ref[...] = c_new
    h_out_ref[...] = h_new

    # ---- 6 actor heads: one fused matmul + per-head softmax, ONE wide store ----
    logits = (jnp.dot(h_new, wa_ref[...], preferred_element_type=jnp.float32)
              + ba_ref[...])
    probs = []
    for hd in range(NUM_HEADS):
        l = logits[:, hd * ACTION_SIZE:(hd + 1) * ACTION_SIZE]
        m = jnp.max(l, axis=-1, keepdims=True)
        e = jnp.exp(l - m)
        probs.append(e / jnp.sum(e, axis=-1, keepdims=True))
    pol = jnp.concatenate(probs, axis=-1)
    # clamp(max=1-1e-20): exactly 1.0 in f32 — kept to mirror the PyTorch code.
    pol_ref[...] = jnp.minimum(pol, jnp.float32(1.0 - 1e-20))

    # ---- critic ----
    v_ref[...] = (jnp.dot(h_new, wc_ref[...], preferred_element_type=jnp.float32)
                  + bc_ref[...])


def pallas_fused_head(conv_flat, non_rgb, h0, c0, p):
    B, H = h0.shape
    NA = NUM_HEADS * ACTION_SIZE
    return pl.pallas_call(
        _fused_head_kernel,
        out_shape=(jax.ShapeDtypeStruct((B, NA), jnp.float32),
                   jax.ShapeDtypeStruct((B, 1), jnp.float32),
                   jax.ShapeDtypeStruct((B, H), jnp.float32),
                   jax.ShapeDtypeStruct((B, H), jnp.float32)),
        in_specs=[VMEM_SPEC] * 14,
        out_specs=(VMEM_SPEC, VMEM_SPEC, VMEM_SPEC, VMEM_SPEC),
    )(conv_flat, non_rgb, h0, c0,
      p["fc1_wa"], p["fc1_wb"], p["fc1_b"],
      p["lstm_wih"], p["lstm_whh"], p["lstm_b"],
      p["actors_w"], p["actors_b"],
      p["critic_w"], p["critic_b"])


# ----------------------------------------------------------------------------
# Parameters (deterministic orthogonal weights, zero biases — mirrors __init__)
# All weights are stored pre-transposed / pre-flattened so the forward pass
# emits no per-step transpose or reshape copies.
# ----------------------------------------------------------------------------
def _orthogonal(key, shape):
    rows = shape[0]
    cols = int(math.prod(shape[1:]))
    big, small = max(rows, cols), min(rows, cols)
    a = jax.random.normal(key, (big, small), jnp.float32)
    q, r = jnp.linalg.qr(a)
    q = q * jnp.sign(jnp.diagonal(r))
    if rows < cols:
        q = q.T
    return q[:rows, :cols].reshape(shape).astype(jnp.float32)


def init_params(key, non_rgb_size, hidden_size):
    keys = jax.random.split(key, 12)
    H = hidden_size

    conv1_w = _orthogonal(keys[0], (16, 6, 8, 8))
    conv2_w = _orthogonal(keys[1], (32, 16, 5, 5))

    # fc1 in torch layout (H, 1152+nr); split into conv / non_rgb parts and
    # permute the conv rows from NCHW-flatten (c,h,w) to NHWC-flatten (h,w,c).
    fc1_w = _orthogonal(keys[2], (H, 1152 + non_rgb_size))
    w1a = fc1_w[:, :1152].reshape(H, 32, 6, 6)                 # (H, c, h, w)
    w1a = jnp.transpose(w1a, (2, 3, 1, 0)).reshape(1152, H)    # rows in (h,w,c)
    w1b = jnp.transpose(fc1_w[:, 1152:])                       # (nr, H)

    lstm_w_ih = _orthogonal(keys[3], (4 * H, H))
    lstm_w_hh = _orthogonal(keys[4], (4 * H, H))

    critic_w = _orthogonal(keys[5], (1, H))
    actor_ws = [_orthogonal(keys[6 + i], (ACTION_SIZE, H))
                for i in range(NUM_HEADS)]

    return {
        # conv weights flattened to (IC*KH*KW, OC) — matches patches ordering
        "conv1_w": jnp.transpose(conv1_w.reshape(16, 6 * 8 * 8)),   # (384, 16)
        "conv1_b": jnp.zeros((1, 16), jnp.float32),
        "conv2_w": jnp.transpose(conv2_w.reshape(32, 16 * 5 * 5)),  # (400, 32)
        "conv2_b": jnp.zeros((1, 32), jnp.float32),
        "fc1_wa": w1a,                                              # (1152, H)
        "fc1_wb": w1b,                                              # (nr, H)
        "fc1_b": jnp.zeros((1, H), jnp.float32),
        "lstm_wih": jnp.transpose(lstm_w_ih),                       # (H, 4H)
        "lstm_whh": jnp.transpose(lstm_w_hh),                       # (H, 4H)
        "lstm_b": jnp.zeros((1, 4 * H), jnp.float32),               # b_ih + b_hh
        "actors_w": jnp.transpose(jnp.concatenate(actor_ws, 0)),    # (H, 30)
        "actors_b": jnp.zeros((1, NUM_HEADS * ACTION_SIZE), jnp.float32),
        "critic_w": jnp.transpose(critic_w),                        # (H, 1)
        "critic_b": jnp.zeros((1, 1), jnp.float32),
    }


# ----------------------------------------------------------------------------
# Forward (matches ActorCritic.forward)
# ----------------------------------------------------------------------------
@jax.jit
def actor_critic_forward(params, non_rgb_state, rgb_state, h):
    h0, c0 = h
    B = rgb_state.shape[0]

    # conv1: NCHW input -> NHWC patches (feature order: c-major, kh, kw) ->
    #        Pallas matmul + bias + ReLU. Patch channel order matches the
    #        torch weight flatten w.reshape(OC, IC*KH*KW).
    p1 = jax.lax.conv_general_dilated_patches(
        rgb_state, filter_shape=(8, 8), window_strides=(4, 4),
        padding=((1, 1), (1, 1)),
        dimension_numbers=("NCHW", "OIHW", "NHWC"))         # (B, 15, 15, 384)
    oh1, ow1, k1 = p1.shape[1], p1.shape[2], p1.shape[3]
    cols1 = p1.reshape(B, oh1 * ow1, k1)
    y1 = pallas_conv_matmul(cols1, params["conv1_w"], params["conv1_b"])
    y1 = y1.reshape(B, oh1, ow1, 16)                        # NHWC, free reshape

    # conv2: NHWC patches -> Pallas matmul + bias + ReLU.
    p2 = jax.lax.conv_general_dilated_patches(
        y1, filter_shape=(5, 5), window_strides=(2, 2),
        padding=((0, 0), (0, 0)),
        dimension_numbers=("NHWC", "HWIO", "NHWC"))         # (B, 6, 6, 400)
    oh2, ow2, k2 = p2.shape[1], p2.shape[2], p2.shape[3]
    cols2 = p2.reshape(B, oh2 * ow2, k2)
    y2 = pallas_conv_matmul(cols2, params["conv2_w"], params["conv2_b"])

    # NHWC flatten (h, w, c) — fc1_wa rows were permuted at init to match.
    conv_flat = y2.reshape(B, -1)                           # (B, 1152)

    # Fused fc1 + LSTMCell + actor heads + critic (single pallas_call).
    pol, V, h_new, c_new = pallas_fused_head(conv_flat, non_rgb_state,
                                             h0, c0, params)

    policies = tuple(pol[:, i * ACTION_SIZE:(i + 1) * ACTION_SIZE]
                     for i in range(NUM_HEADS))
    return policies, V, (h_new, c_new)


# ----------------------------------------------------------------------------
if __name__ == "__main__":
    B = 2
    hidden_size = 32
    non_rgb_size = 8

    key = jax.random.PRNGKey(0)
    k_par, k_nr, k_rgb, k_h, k_c = jax.random.split(key, 5)

    params = init_params(k_par, non_rgb_size, hidden_size)

    non_rgb_state = jax.random.normal(k_nr, (B, non_rgb_size), jnp.float32)
    rgb_state = jax.random.normal(k_rgb, (B, 6, 64, 64), jnp.float32)
    h0 = jax.random.normal(k_h, (B, hidden_size), jnp.float32)
    c0 = jax.random.normal(k_c, (B, hidden_size), jnp.float32)

    policies, V, (h_new, c_new) = actor_critic_forward(
        params, non_rgb_state, rgb_state, (h0, c0))
    jax.block_until_ready((policies, V, h_new, c_new))

    assert len(policies) == NUM_HEADS
    assert all(p.shape == (B, ACTION_SIZE) for p in policies)
    assert V.shape == (B, 1)
    assert h_new.shape == (B, hidden_size) and c_new.shape == (B, hidden_size)
    for p in policies:
        assert bool(jnp.all(jnp.abs(jnp.sum(p, axis=1) - 1.0) < 1e-4))
        assert bool(jnp.all(p >= 0.0))

    print("KERNEL_OK")
</pallas_src>

<mosaic_0001>
module attributes {stable_mosaic.version = 11 : i64} {
  func.func @_conv_mm_kernel(%arg0: i32, %arg1: memref<1x225x384xf32, #tpu.memory_space<vmem>>, %arg2: memref<384x16xf32, #tpu.memory_space<vmem>>, %arg3: memref<1x16xf32, #tpu.memory_space<vmem>>, %arg4: memref<1x225x16xf32, #tpu.memory_space<vmem>>) attributes {dimension_semantics = [#tpu.dimension_semantics<parallel>], iteration_bounds = array<i64: 2>, scalar_prefetch = 0 : i64, scratch_operands = 0 : i64, tpu.core_type = #tpu.core_type<tc>, window_params = [{transform_indices = @transform_0, window_bounds = array<i64: 1, 225, 384>}, {pipeline_mode = #tpu.pipeline_mode<synchronous>, transform_indices = @transform_1, window_bounds = array<i64: 384, 16>}, {pipeline_mode = #tpu.pipeline_mode<synchronous>, transform_indices = @transform_2, window_bounds = array<i64: 1, 16>}, {transform_indices = @transform_3, window_bounds = array<i64: 1, 225, 16>}]} {
    %c0 = arith.constant 0 : index
    %c0_0 = arith.constant 0 : index
    %c0_1 = arith.constant 0 : index
    %0 = vector.load %arg1[%c0, %c0_0, %c0_1] : memref<1x225x384xf32, #tpu.memory_space<vmem>>, vector<1x225x384xf32>
    %1 = vector.shape_cast %0 : vector<1x225x384xf32> to vector<225x384xf32>
    %c0_2 = arith.constant 0 : index
    %c0_3 = arith.constant 0 : index
    %2 = vector.load %arg2[%c0_2, %c0_3] : memref<384x16xf32, #tpu.memory_space<vmem>>, vector<384x16xf32>
    %cst = arith.constant dense<0.000000e+00> : vector<225x16xf32>
    %3 = tpu.matmul %1, %2, %cst {dimension_numbers = #tpu.dot_dimension_numbers<[1], [0], [0], [1], [0, 0, 1, 1], [], []>} : vector<225x384xf32>, vector<384x16xf32>, vector<225x16xf32> -> vector<225x16xf32>
    %c0_4 = arith.constant 0 : index
    %c0_5 = arith.constant 0 : index
    %4 = vector.load %arg3[%c0_4, %c0_5] : memref<1x16xf32, #tpu.memory_space<vmem>>, vector<1x16xf32>
    %5 = vector.broadcast %4 : vector<1x16xf32> to vector<225x16xf32>
    %6 = arith.addf %3, %5 : vector<225x16xf32>
    %cst_6 = arith.constant 0.000000e+00 : f32
    %7 = vector.broadcast %cst_6 : f32 to vector<225x16xf32>
    %8 = arith.maximumf %6, %7 : vector<225x16xf32>
    %c0_7 = arith.constant 0 : index
    %c0_8 = arith.constant 0 : index
    %c0_9 = arith.constant 0 : index
    %9 = vector.load %arg4[%c0_7, %c0_8, %c0_9] : memref<1x225x16xf32, #tpu.memory_space<vmem>>, vector<1x225x16xf32>
    %10 = vector.shape_cast %9 : vector<1x225x16xf32> to vector<225x16xf32>
    %11 = vector.shape_cast %8 : vector<225x16xf32> to vector<1x225x16xf32>
    tpu.vector_store %arg4[%c0_7, %c0_8, %c0_9], %11 {strides = array<i32>} : memref<1x225x16xf32, #tpu.memory_space<vmem>>, vector<1x225x16xf32>,
    return
  }
  func.func @transform_0(%arg0: i32) -> (i32, i32, i32) {
    %c0_i32 = arith.constant 0 : i32
    %c0_i32_0 = arith.constant 0 : i32
    %c0_i32_1 = arith.constant 0 : i32
    return %arg0, %c0_i32, %c0_i32_0 : i32, i32, i32
  }
  func.func @transform_1(%arg0: i32) -> (i32, i32) {
    %c0_i32 = arith.constant 0 : i32
    %c0_i32_0 = arith.constant 0 : i32
    %c0_i32_1 = arith.constant 0 : i32
    return %c0_i32, %c0_i32_0 : i32, i32
  }
  func.func @transform_2(%arg0: i32) -> (i32, i32) {
    %c0_i32 = arith.constant 0 : i32
    %c0_i32_0 = arith.constant 0 : i32
    %c0_i32_1 = arith.constant 0 : i32
    return %c0_i32, %c0_i32_0 : i32, i32
  }
  func.func @transform_3(%arg0: i32) -> (i32, i32, i32) {
    %c0_i32 = arith.constant 0 : i32
    %c0_i32_0 = arith.constant 0 : i32
    %c0_i32_1 = arith.constant 0 : i32
    return %arg0, %c0_i32, %c0_i32_0 : i32, i32, i32
  }
}

module attributes {stable_mosaic.version = 11 : i64} {
  func.func @_conv_mm_kernel(%arg0: i32, %arg1: memref<1x36x400xf32, #tpu.memory_space<vmem>>, %arg2: memref<400x32xf32, #tpu.memory_space<vmem>>, %arg3: memref<1x32xf32, #tpu.memory_space<vmem>>, %arg4: memref<1x36x32xf32, #tpu.memory_space<vmem>>) attributes {dimension_semantics = [#tpu.dimension_semantics<parallel>], iteration_bounds = array<i64: 2>, scalar_prefetch = 0 : i64, scratch_operands = 0 : i64, tpu.core_type = #tpu.core_type<tc>, window_params = [{transform_indices = @transform_0, window_bounds = array<i64: 1, 36, 400>}, {pipeline_mode = #tpu.pipeline_mode<synchronous>, transform_indices = @transform_1, window_bounds = array<i64: 400, 32>}, {pipeline_mode = #tpu.pipeline_mode<synchronous>, transform_indices = @transform_2, window_bounds = array<i64: 1, 32>}, {transform_indices = @transform_3, window_bounds = array<i64: 1, 36, 32>}]} {
    %c0 = arith.constant 0 : index
    %c0_0 = arith.constant 0 : index
    %c0_1 = arith.constant 0 : index
    %0 = vector.load %arg1[%c0, %c0_0, %c0_1] : memref<1x36x400xf32, #tpu.memory_space<vmem>>, vector<1x36x400xf32>
    %1 = vector.shape_cast %0 : vector<1x36x400xf32> to vector<36x400xf32>
    %c0_2 = arith.constant 0 : index
    %c0_3 = arith.constant 0 : index
    %2 = vector.load %arg2[%c0_2, %c0_3] : memref<400x32xf32, #tpu.memory_space<vmem>>, vector<400x32xf32>
    %cst = arith.constant dense<0.000000e+00> : vector<36x32xf32>
    %3 = tpu.matmul %1, %2, %cst {dimension_numbers = #tpu.dot_dimension_numbers<[1], [0], [0], [1], [0, 0, 1, 1], [], []>} : vector<36x400xf32>, vector<400x32xf32>, vector<36x32xf32> -> vector<36x32xf32>
    %c0_4 = arith.constant 0 : index
    %c0_5 = arith.constant 0 : index
    %4 = vector.load %arg3[%c0_4, %c0_5] : memref<1x32xf32, #tpu.memory_space<vmem>>, vector<1x32xf32>
    %5 = vector.broadcast %4 : vector<1x32xf32> to vector<36x32xf32>
    %6 = arith.addf %3, %5 : vector<36x32xf32>
    %cst_6 = arith.constant 0.000000e+00 : f32
    %7 = vector.broadcast %cst_6 : f32 to vector<36x32xf32>
    %8 = arith.maximumf %6, %7 : vector<36x32xf32>
    %c0_7 = arith.constant 0 : index
    %c0_8 = arith.constant 0 : index
    %c0_9 = arith.constant 0 : index
    %9 = vector.load %arg4[%c0_7, %c0_8, %c0_9] : memref<1x36x32xf32, #tpu.memory_space<vmem>>, vector<1x36x32xf32>
    %10 = vector.shape_cast %9 : vector<1x36x32xf32> to vector<36x32xf32>
    %11 = vector.shape_cast %8 : vector<36x32xf32> to vector<1x36x32xf32>
    tpu.vector_store %arg4[%c0_7, %c0_8, %c0_9], %11 {strides = array<i32>} : memref<1x36x32xf32, #tpu.memory_space<vmem>>, vector<1x36x32xf32>,
    return
  }
  func.func @transform_0(%arg0: i32) -> (i32, i32, i32) {
    %c0_i32 = arith.constant 0 : i32
    %c0_i32_0 = arith.constant 0 : i32
    %c0_i32_1 = arith.constant 0 : i32
    return %arg0, %c0_i32, %c0_i32_0 : i32, i32, i32
  }
  func.func @transform_1(%arg0: i32) -> (i32, i32) {
    %c0_i32 = arith.constant 0 : i32
    %c0_i32_0 = arith.constant 0 : i32
    %c0_i32_1 = arith.constant 0 : i32
    return %c0_i32, %c0_i32_0 : i32, i32
  }
  func.func @transform_2(%arg0: i32) -> (i32, i32) {
    %c0_i32 = arith.constant 0 : i32
    %c0_i32_0 = arith.constant 0 : i32
    %c0_i32_1 = arith.constant 0 : i32
    return %c0_i32, %c0_i32_0 : i32, i32
  }
  func.func @transform_3(%arg0: i32) -> (i32, i32, i32) {
    %c0_i32 = arith.constant 0 : i32
    %c0_i32_0 = arith.constant 0 : i32
    %c0_i32_1 = arith.constant 0 : i32
    return %arg0, %c0_i32, %c0_i32_0 : i32, i32, i32
  }
}

module attributes {stable_mosaic.version = 11 : i64} {
  func.func @_fused_head_kernel(%arg0: memref<2x1152xf32, #tpu.memory_space<vmem>>, %arg1: memref<2x8xf32, #tpu.memory_space<vmem>>, %arg2: memref<2x32xf32, #tpu.memory_space<vmem>>, %arg3: memref<2x32xf32, #tpu.memory_space<vmem>>, %arg4: memref<1152x32xf32, #tpu.memory_space<vmem>>, %arg5: memref<8x32xf32, #tpu.memory_space<vmem>>, %arg6: memref<1x32xf32, #tpu.memory_space<vmem>>, %arg7: memref<32x128xf32, #tpu.memory_space<vmem>>, %arg8: memref<32x128xf32, #tpu.memory_space<vmem>>, %arg9: memref<1x128xf32, #tpu.memory_space<vmem>>, %arg10: memref<32x30xf32, #tpu.memory_space<vmem>>, %arg11: memref<1x30xf32, #tpu.memory_space<vmem>>, %arg12: memref<32x1xf32, #tpu.memory_space<vmem>>, %arg13: memref<1x1xf32, #tpu.memory_space<vmem>>, %arg14: memref<2x30xf32, #tpu.memory_space<vmem>>, %arg15: memref<2x1xf32, #tpu.memory_space<vmem>>, %arg16: memref<2x32xf32, #tpu.memory_space<vmem>>, %arg17: memref<2x32xf32, #tpu.memory_space<vmem>>) attributes {dimension_semantics = [], scalar_prefetch = 0 : i64, scratch_operands = 0 : i64, tpu.core_type = #tpu.core_type<tc>} {
    %c0 = arith.constant 0 : index
    %c0_0 = arith.constant 0 : index
    %0 = vector.load %arg0[%c0, %c0_0] : memref<2x1152xf32, #tpu.memory_space<vmem>>, vector<2x1152xf32>
    %c0_1 = arith.constant 0 : index
    %c0_2 = arith.constant 0 : index
    %1 = vector.load %arg4[%c0_1, %c0_2] : memref<1152x32xf32, #tpu.memory_space<vmem>>, vector<1152x32xf32>
    %cst = arith.constant dense<0.000000e+00> : vector<2x32xf32>
    %2 = tpu.matmul %0, %1, %cst {dimension_numbers = #tpu.dot_dimension_numbers<[1], [0], [0], [1], [0, 0, 1, 1], [], []>} : vector<2x1152xf32>, vector<1152x32xf32>, vector<2x32xf32> -> vector<2x32xf32>
    %c0_3 = arith.constant 0 : index
    %c0_4 = arith.constant 0 : index
    %3 = vector.load %arg1[%c0_3, %c0_4] : memref<2x8xf32, #tpu.memory_space<vmem>>, vector<2x8xf32>
    %c0_5 = arith.constant 0 : index
    %c0_6 = arith.constant 0 : index
    %4 = vector.load %arg5[%c0_5, %c0_6] : memref<8x32xf32, #tpu.memory_space<vmem>>, vector<8x32xf32>
    %cst_7 = arith.constant dense<0.000000e+00> : vector<2x32xf32>
    %5 = tpu.matmul %3, %4, %cst_7 {dimension_numbers = #tpu.dot_dimension_numbers<[1], [0], [0], [1], [0, 0, 1, 1], [], []>} : vector<2x8xf32>, vector<8x32xf32>, vector<2x32xf32> -> vector<2x32xf32>
    %6 = arith.addf %2, %5 : vector<2x32xf32>
    %c0_8 = arith.constant 0 : index
    %c0_9 = arith.constant 0 : index
    %7 = vector.load %arg6[%c0_8, %c0_9] : memref<1x32xf32, #tpu.memory_space<vmem>>, vector<1x32xf32>
    %8 = vector.broadcast %7 : vector<1x32xf32> to vector<2x32xf32>
    %9 = arith.addf %6, %8 : vector<2x32xf32>
    %c0_10 = arith.constant 0 : index
    %c0_11 = arith.constant 0 : index
    %10 = vector.load %arg7[%c0_10, %c0_11] : memref<32x128xf32, #tpu.memory_space<vmem>>, vector<32x128xf32>
    %cst_12 = arith.constant dense<0.000000e+00> : vector<2x128xf32>
    %11 = tpu.matmul %9, %10, %cst_12 {dimension_numbers = #tpu.dot_dimension_numbers<[1], [0], [0], [1], [0, 0, 1, 1], [], []>} : vector<2x32xf32>, vector<32x128xf32>, vector<2x128xf32> -> vector<2x128xf32>
    %c0_13 = arith.constant 0 : index
    %c0_14 = arith.constant 0 : index
    %12 = vector.load %arg2[%c0_13, %c0_14] : memref<2x32xf32, #tpu.memory_space<vmem>>, vector<2x32xf32>
    %c0_15 = arith.constant 0 : index
    %c0_16 = arith.constant 0 : index
    %13 = vector.load %arg8[%c0_15, %c0_16] : memref<32x128xf32, #tpu.memory_space<vmem>>, vector<32x128xf32>
    %cst_17 = arith.constant dense<0.000000e+00> : vector<2x128xf32>
    %14 = tpu.matmul %12, %13, %cst_17 {dimension_numbers = #tpu.dot_dimension_numbers<[1], [0], [0], [1], [0, 0, 1, 1], [], []>} : vector<2x32xf32>, vector<32x128xf32>, vector<2x128xf32> -> vector<2x128xf32>
    %15 = arith.addf %11, %14 : vector<2x128xf32>
    %c0_18 = arith.constant 0 : index
    %c0_19 = arith.constant 0 : index
    %16 = vector.load %arg9[%c0_18, %c0_19] : memref<1x128xf32, #tpu.memory_space<vmem>>, vector<1x128xf32>
    %17 = vector.broadcast %16 : vector<1x128xf32> to vector<2x128xf32>
    %18 = arith.addf %15, %17 : vector<2x128xf32>
    %19 = vector.extract_strided_slice %18 {offsets = [0, 0], sizes = [2, 32], strides = [1, 1]} : vector<2x128xf32> to vector<2x32xf32>
    %20 = arith.negf %19 : vector<2x32xf32>
    %21 = math.exp %20 : vector<2x32xf32>
    %cst_20 = arith.constant 1.000000e+00 : f32
    %22 = vector.broadcast %cst_20 : f32 to vector<2x32xf32>
    %23 = arith.addf %22, %21 : vector<2x32xf32>
    %24 = arith.divf %22, %23 : vector<2x32xf32>
    %25 = vector.extract_strided_slice %18 {offsets = [0, 32], sizes = [2, 32], strides = [1, 1]} : vector<2x128xf32> to vector<2x32xf32>
    %26 = arith.negf %25 : vector<2x32xf32>
    %27 = math.exp %26 : vector<2x32xf32>
    %cst_21 = arith.constant 1.000000e+00 : f32
    %28 = vector.broadcast %cst_21 : f32 to vector<2x32xf32>
    %29 = arith.addf %28, %27 : vector<2x32xf32>
    %30 = arith.divf %28, %29 : vector<2x32xf32>
    %31 = vector.extract_strided_slice %18 {offsets = [0, 64], sizes = [2, 32], strides = [1, 1]} : vector<2x128xf32> to vector<2x32xf32>
    %32 = math.tanh %31 : vector<2x32xf32>
    %33 = vector.extract_strided_slice %18 {offsets = [0, 96], sizes = [2, 32], strides = [1, 1]} : vector<2x128xf32> to vector<2x32xf32>
    %34 = arith.negf %33 : vector<2x32xf32>
    %35 = math.exp %34 : vector<2x32xf32>
    %cst_22 = arith.constant 1.000000e+00 : f32
    %36 = vector.broadcast %cst_22 : f32 to vector<2x32xf32>
    %37 = arith.addf %36, %35 : vector<2x32xf32>
    %38 = arith.divf %36, %37 : vector<2x32xf32>
    %c0_23 = arith.constant 0 : index
    %c0_24 = arith.constant 0 : index
    %39 = vector.load %arg3[%c0_23, %c0_24] : memref<2x32xf32, #tpu.memory_space<vmem>>, vector<2x32xf32>
    %40 = arith.mulf %30, %39 : vector<2x32xf32>
    %41 = arith.mulf %24, %32 : vector<2x32xf32>
    %42 = arith.addf %40, %41 : vector<2x32xf32>
    %43 = math.tanh %42 : vector<2x32xf32>
    %44 = arith.mulf %38, %43 : vector<2x32xf32>
    %c0_25 = arith.constant 0 : index
    %c0_26 = arith.constant 0 : index
    %45 = vector.load %arg17[%c0_25, %c0_26] : memref<2x32xf32, #tpu.memory_space<vmem>>, vector<2x32xf32>
    tpu.vector_store %arg17[%c0_25, %c0_26], %42 {strides = array<i32>} : memref<2x32xf32, #tpu.memory_space<vmem>>, vector<2x32xf32>,
    %c0_27 = arith.constant 0 : index
    %c0_28 = arith.constant 0 : index
    %46 = vector.load %arg16[%c0_27, %c0_28] : memref<2x32xf32, #tpu.memory_space<vmem>>, vector<2x32xf32>
    tpu.vector_store %arg16[%c0_27, %c0_28], %44 {strides = array<i32>} : memref<2x32xf32, #tpu.memory_space<vmem>>, vector<2x32xf32>,
    %c0_29 = arith.constant 0 : index
    %c0_30 = arith.constant 0 : index
    %47 = vector.load %arg10[%c0_29, %c0_30] : memref<32x30xf32, #tpu.memory_space<vmem>>, vector<32x30xf32>
    %cst_31 = arith.constant dense<0.000000e+00> : vector<2x30xf32>
    %48 = tpu.matmul %44, %47, %cst_31 {dimension_numbers = #tpu.dot_dimension_numbers<[1], [0], [0], [1], [0, 0, 1, 1], [], []>} : vector<2x32xf32>, vector<32x30xf32>, vector<2x30xf32> -> vector<2x30xf32>
    %c0_32 = arith.constant 0 : index
    %c0_33 = arith.constant 0 : index
    %49 = vector.load %arg11[%c0_32, %c0_33] : memref<1x30xf32, #tpu.memory_space<vmem>>, vector<1x30xf32>
    %50 = vector.broadcast %49 : vector<1x30xf32> to vector<2x30xf32>
    %51 = arith.addf %48, %50 : vector<2x30xf32>
    %52 = vector.extract_strided_slice %51 {offsets = [0, 0], sizes = [2, 5], strides = [1, 1]} : vector<2x30xf32> to vector<2x5xf32>
    %cst_34 = arith.constant dense<0xFF800000> : vector<2xf32>
    %53 = vector.multi_reduction <maximumf>, %52, %cst_34 [1] : vector<2x5xf32> to vector<2xf32>
    %54 = vector.shape_cast %53 : vector<2xf32> to vector<2x1xf32>
    %55 = vector.broadcast %54 : vector<2x1xf32> to vector<2x5xf32>
    %56 = arith.subf %52, %55 : vector<2x5xf32>
    %57 = math.exp %56 : vector<2x5xf32>
    %cst_35 = arith.constant dense<0.000000e+00> : vector<2xf32>
    %58 = vector.multi_reduction <add>, %57, %cst_35 [1] : vector<2x5xf32> to vector<2xf32>
    %59 = vector.shape_cast %58 : vector<2xf32> to vector<2x1xf32>
    %60 = vector.broadcast %59 : vector<2x1xf32> to vector<2x5xf32>
    %61 = arith.divf %57, %60 : vector<2x5xf32>
    %62 = vector.extract_strided_slice %51 {offsets = [0, 5], sizes = [2, 5], strides = [1, 1]} : vector<2x30xf32> to vector<2x5xf32>
    %cst_36 = arith.constant dense<0xFF800000> : vector<2xf32>
    %63 = vector.multi_reduction <maximumf>, %62, %cst_36 [1] : vector<2x5xf32> to vector<2xf32>
    %64 = vector.shape_cast %63 : vector<2xf32> to vector<2x1xf32>
    %65 = vector.broadcast %64 : vector<2x1xf32> to vector<2x5xf32>
    %66 = arith.subf %62, %65 : vector<2x5xf32>
    %67 = math.exp %66 : vector<2x5xf32>
    %cst_37 = arith.constant dense<0.000000e+00> : vector<2xf32>
    %68 = vector.multi_reduction <add>, %67, %cst_37 [1] : vector<2x5xf32> to vector<2xf32>
    %69 = vector.shape_cast %68 : vector<2xf32> to vector<2x1xf32>
    %70 = vector.broadcast %69 : vector<2x1xf32> to vector<2x5xf32>
    %71 = arith.divf %67, %70 : vector<2x5xf32>
    %72 = vector.extract_strided_slice %51 {offsets = [0, 10], sizes = [2, 5], strides = [1, 1]} : vector<2x30xf32> to vector<2x5xf32>
    %cst_38 = arith.constant dense<0xFF800000> : vector<2xf32>
    %73 = vector.multi_reduction <maximumf>, %72, %cst_38 [1] : vector<2x5xf32> to vector<2xf32>
    %74 = vector.shape_cast %73 : vector<2xf32> to vector<2x1xf32>
    %75 = vector.broadcast %74 : vector<2x1xf32> to vector<2x5xf32>
    %76 = arith.subf %72, %75 : vector<2x5xf32>
    %77 = math.exp %76 : vector<2x5xf32>
    %cst_39 = arith.constant dense<0.000000e+00> : vector<2xf32>
    %78 = vector.multi_reduction <add>, %77, %cst_39 [1] : vector<2x5xf32> to vector<2xf32>
    %79 = vector.shape_cast %78 : vector<2xf32> to vector<2x1xf32>
    %80 = vector.broadcast %79 : vector<2x1xf32> to vector<2x5xf32>
    %81 = arith.divf %77, %80 : vector<2x5xf32>
    %82 = vector.extract_strided_slice %51 {offsets = [0, 15], sizes = [2, 5], strides = [1, 1]} : vector<2x30xf32> to vector<2x5xf32>
    %cst_40 = arith.constant dense<0xFF800000> : vector<2xf32>
    %83 = vector.multi_reduction <maximumf>, %82, %cst_40 [1] : vector<2x5xf32> to vector<2xf32>
    %84 = vector.shape_cast %83 : vector<2xf32> to vector<2x1xf32>
    %85 = vector.broadcast %84 : vector<2x1xf32> to vector<2x5xf32>
    %86 = arith.subf %82, %85 : vector<2x5xf32>
    %87 = math.exp %86 : vector<2x5xf32>
    %cst_41 = arith.constant dense<0.000000e+00> : vector<2xf32>
    %88 = vector.multi_reduction <add>, %87, %cst_41 [1] : vector<2x5xf32> to vector<2xf32>
    %89 = vector.shape_cast %88 : vector<2xf32> to vector<2x1xf32>
    %90 = vector.broadcast %89 : vector<2x1xf32> to vector<2x5xf32>
    %91 = arith.divf %87, %90 : vector<2x5xf32>
    %92 = vector.extract_strided_slice %51 {offsets = [0, 20], sizes = [2, 5], strides = [1, 1]} : vector<2x30xf32> to vector<2x5xf32>
    %cst_42 = arith.constant dense<0xFF800000> : vector<2xf32>
    %93 = vector.multi_reduction <maximumf>, %92, %cst_42 [1] : vector<2x5xf32> to vector<2xf32>
    %94 = vector.shape_cast %93 : vector<2xf32> to vector<2x1xf32>
    %95 = vector.broadcast %94 : vector<2x1xf32> to vector<2x5xf32>
    %96 = arith.subf %92, %95 : vector<2x5xf32>
    %97 = math.exp %96 : vector<2x5xf32>
    %cst_43 = arith.constant dense<0.000000e+00> : vector<2xf32>
    %98 = vector.multi_reduction <add>, %97, %cst_43 [1] : vector<2x5xf32> to vector<2xf32>
    %99 = vector.shape_cast %98 : vector<2xf32> to vector<2x1xf32>
    %100 = vector.broadcast %99 : vector<2x1xf32> to vector<2x5xf32>
    %101 = arith.divf %97, %100 : vector<2x5xf32>
    %102 = vector.extract_strided_slice %51 {offsets = [0, 25], sizes = [2, 5], strides = [1, 1]} : vector<2x30xf32> to vector<2x5xf32>
    %cst_44 = arith.constant dense<0xFF800000> : vector<2xf32>
    %103 = vector.multi_reduction <maximumf>, %102, %cst_44 [1] : vector<2x5xf32> to vector<2xf32>
    %104 = vector.shape_cast %103 : vector<2xf32> to vector<2x1xf32>
    %105 = vector.broadcast %104 : vector<2x1xf32> to vector<2x5xf32>
    %106 = arith.subf %102, %105 : vector<2x5xf32>
    %107 = math.exp %106 : vector<2x5xf32>
    %cst_45 = arith.constant dense<0.000000e+00> : vector<2xf32>
    %108 = vector.multi_reduction <add>, %107, %cst_45 [1] : vector<2x5xf32> to vector<2xf32>
    %109 = vector.shape_cast %108 : vector<2xf32> to vector<2x1xf32>
    %110 = vector.broadcast %109 : vector<2x1xf32> to vector<2x5xf32>
    %111 = arith.divf %107, %110 : vector<2x5xf32>
    %112 = tpu.concatenate %61, %71, %81, %91, %101, %111 in 1 : vector<2x5xf32>, vector<2x5xf32>, vector<2x5xf32>, vector<2x5xf32>, vector<2x5xf32>, vector<2x5xf32> -> vector<2x30xf32>
    %cst_46 = arith.constant 1.000000e+00 : f32
    %113 = vector.broadcast %cst_46 : f32 to vector<2x30xf32>
    %114 = arith.minimumf %112, %113 : vector<2x30xf32>
    %c0_47 = arith.constant 0 : index
    %c0_48 = arith.constant 0 : index
    %115 = vector.load %arg14[%c0_47, %c0_48] : memref<2x30xf32, #tpu.memory_space<vmem>>, vector<2x30xf32>
    tpu.vector_store %arg14[%c0_47, %c0_48], %114 {strides = array<i32>} : memref<2x30xf32, #tpu.memory_space<vmem>>, vector<2x30xf32>,
    %c0_49 = arith.constant 0 : index
    %c0_50 = arith.constant 0 : index
    %116 = vector.load %arg12[%c0_49, %c0_50] : memref<32x1xf32, #tpu.memory_space<vmem>>, vector<32x1xf32>
    %cst_51 = arith.constant dense<0.000000e+00> : vector<2x1xf32>
    %117 = tpu.matmul %44, %116, %cst_51 {dimension_numbers = #tpu.dot_dimension_numbers<[1], [0], [0], [1], [0, 0, 1, 1], [], []>} : vector<2x32xf32>, vector<32x1xf32>, vector<2x1xf32> -> vector<2x1xf32>
    %c0_52 = arith.constant 0 : index
    %c0_53 = arith.constant 0 : index
    %118 = vector.load %arg13[%c0_52, %c0_53] : memref<1x1xf32, #tpu.memory_space<vmem>>, vector<1x1xf32>
    %119 = vector.broadcast %118 : vector<1x1xf32> to vector<2x1xf32>
    %120 = arith.addf %117, %119 : vector<2x1xf32>
    %c0_54 = arith.constant 0 : index
    %c0_55 = arith.constant 0 : index
    %121 = vector.load %arg15[%c0_54, %c0_55] : memref<2x1xf32, #tpu.memory_space<vmem>>, vector<2x1xf32>
    tpu.vector_store %arg15[%c0_54, %c0_55], %120 {strides = array<i32>} : memref<2x1xf32, #tpu.memory_space<vmem>>, vector<2x1xf32>,
    return
  }
}

</mosaic_0001>

<bundles_post_ra>
// kernel: actor_critic_forward.3
= control target key start
LH: loop header
LB: loop body
LE: loop exit
PB: predicated region body
PF: predicated region fallthrough
CT: control target
= control target key end

     0   :  { %s1064_s12 = smov 0   ;;  %s1521_s0 = inlined_call_operand.vmem [shape: f32[2,225,384], index: 0, kind: input, shape index: {}]   ;;  %s1522_s1 = inlined_call_operand.vmem [shape: f32[384,16], index: 1, kind: input, shape index: {}]   ;;  %s1523_s2 = inlined_call_operand.vmem [shape: f32[1,16], index: 2, kind: input, shape index: {}]   ;;  %s1524_s3 = inlined_call_operand.vmem [shape: f32[2,225,16], index: 3, kind: output, shape index: {}]  }
   0x1 LB: > { %s848_s13 = sadd.s32 4294967295, %s1040_s12   ;;  %p852_p0 = scmp.ge.s32.totalorder %s1040_s12, 1  ;;  %s1040_s12 = sphi %s1064_s12, %s13_s12  }
   0x2   : > { %p137_p1 = scmp.lt.s32.totalorder %s1040_s12, 3 }
   0x4   : > { %p138_p2 = pnand %p852_p0, %p137_p1 }
   0x5   : > { %p161_p3 = scmp.lt.s32.totalorder (!%p138_p2), %s848_s13, 1 }
   0x6   : > { %141 = sbr.rel (%p138_p2) target bundleno = 388 (0x184), region = 32 }
   0xb   : > { %v273_v0 = vld [vmem:[%s1522_s1 + $0x78] sm:$0xff]  ;;  %v1042_v1 = vmov 0.0   ;;  %v272_v2 = vld [vmem:[%s1522_s1 + $0x70] sm:$0xff]  ;;  %vm1043_vm0 = vmmov 0   ;;  %v271_v3 = vld [vmem:[%s1522_s1 + $0x68] sm:$0xff]  ;;  %s1526_s13 = smov (!%p161_p3, %s848_s13), 1 }
   0xc   : > { %313 = vmatprep.subr.mxu0 %v1042_v1  ;;  %903 = vmatprep.subr.mxu1 %v1042_v1  ;;  %v270_v4 = vld [vmem:[%s1522_s1 + $0x60] sm:$0xff]  ;;  %v305_v5 = vld [vmem:[%s1522_s1 + $0x178] sm:$0xff]  ;;  %v304_v6 = vld [vmem:[%s1522_s1 + $0x170] sm:$0xff]  ;;  %s1022_s16 = smul.u32 696, %s1526_s13  ;;  %vm762_vm1 = vcmask 130048   ;;  %vm791_vm2 = vcmask 122880  }
   0xd   : > { %314 = vmatpush1.msra.mxu0 %v273_v0  ;;  %935 = vmatprep.mubr.msk.f32.mxu1 %vm1043_vm0, %v1042_v1  ;;  %v269_v7 = vld [vmem:[%s1522_s1 + $0x58] sm:$0xff]  ;;  %v303_v8 = vld [vmem:[%s1522_s1 + $0x168] sm:$0xff]  ;;  %v268_v9 = vld [vmem:[%s1522_s1 + $0x50] sm:$0xff] }
   0xe   : > { %315 = vmatprep.subr.mxu0 %v1042_v1  ;;  %904 = vmatpush3.msra.mxu1 %v305_v5  ;;  %v302_v10 = vld [vmem:[%s1522_s1 + $0x160] sm:$0xff]  ;;  %v267_v11 = vld [vmem:[%s1522_s1 + $0x48] sm:$0xff]  ;;  %v301_v12 = vld [vmem:[%s1522_s1 + $0x158] sm:$0xff]  ;;  %s1202_s27 = scalar_lea.vmem %s1521_s0, %s1022_s16 }
   0xf   : > { %316 = vmatpush1.msra.mxu0 %v272_v2  ;;  %905 = vmatprep.subr.mxu1 %v1042_v1  ;;  %v266_v13 = vld [vmem:[%s1522_s1 + $0x40] sm:$0xff]  ;;  %v300_v14 = vld [vmem:[%s1522_s1 + $0x150] sm:$0xff]  ;;  %v265_v15 = vld [vmem:[%s1522_s1 + $0x38] sm:$0xff] }
  0x10   : > { %317 = vmatprep.subr.mxu0 %v1042_v1  ;;  %906 = vmatpush3.msra.mxu1 %v304_v6  ;;  %v299_v16 = vld [vmem:[%s1522_s1 + $0x148] sm:$0xff]  ;;  %v264_v17 = vld [vmem:[%s1522_s1 + $0x30] sm:$0xff]  ;;  %v298_v18 = vld [vmem:[%s1522_s1 + $0x140] sm:$0xff] }
  0x11   : > { %318 = vmatpush1.msra.mxu0 %v271_v3  ;;  %907 = vmatprep.subr.mxu1 %v1042_v1  ;;  %v263_v19 = vld [vmem:[%s1522_s1 + $0x28] sm:$0xff]  ;;  %v297_v20 = vld [vmem:[%s1522_s1 + $0x138] sm:$0xff]  ;;  %v262_v21 = vld [vmem:[%s1522_s1 + $0x20] sm:$0xff] }
  0x12   : > { %319 = vmatprep.subr.mxu0 %v1042_v1  ;;  %908 = vmatpush3.msra.mxu1 %v303_v8  ;;  %v296_v22 = vld [vmem:[%s1522_s1 + $0x130] sm:$0xff]  ;;  %v261_v23 = vld [vmem:[%s1522_s1 + $0x18] sm:$0xff]  ;;  %v295_v24 = vld [vmem:[%s1522_s1 + $0x128] sm:$0xff] }
  0x13   : > { %320 = vmatpush1.msra.mxu0 %v270_v4  ;;  %909 = vmatprep.subr.mxu1 %v1042_v1  ;;  %v260_v25 = vld [vmem:[%s1522_s1 + $0x10] sm:$0xff]  ;;  %v294_v26 = vld [vmem:[%s1522_s1 + $0x120] sm:$0xff]  ;;  %v259_v27 = vld [vmem:[%s1522_s1 + $0x8] sm:$0xff] }
  0x14   : > { %321 = vmatprep.subr.mxu0 %v1042_v1  ;;  %910 = vmatpush3.msra.mxu1 %v302_v10  ;;  %v293_v28 = vld [vmem:[%s1522_s1 + $0x118] sm:$0xff]  ;;  %v258_v29 = vld [vmem:[%s1522_s1] sm:$0xff]  ;;  %v292_v30 = vld [vmem:[%s1522_s1 + $0x110] sm:$0xff] }
  0x15   : > { %322 = vmatpush1.msra.mxu0 %v269_v7  ;;  %911 = vmatprep.subr.mxu1 %v1042_v1  ;;  %v289_v31 = vld [vmem:[%s1522_s1 + $0xf8] sm:$0xff]  ;;  %v291_v32 = vld [vmem:[%s1522_s1 + $0x108] sm:$0xff]  ;;  %v288_v33 = vld [vmem:[%s1522_s1 + $0xf0] sm:$0xff] }
  0x16   : > { %323 = vmatprep.subr.mxu0 %v1042_v1  ;;  %912 = vmatpush3.msra.mxu1 %v301_v12  ;;  %v172_v34 = vld [vmem:[%s1202_s27 + $0x8] sm:$0xff]  ;;  %v290_v35 = vld [vmem:[%s1522_s1 + $0x100] sm:$0xff]  ;;  %v173_v37 = vld [vmem:[%s1202_s27 + $0x10] sm:$0xff] }
  0x17   : > { %324 = vmatpush1.msra.mxu0 %v268_v9  ;;  %913 = vmatprep.subr.mxu1 %v1042_v1  ;;  %v287_v36 = vld [vmem:[%s1522_s1 + $0xe8] sm:$0xff]  ;;  %v286_v38 = vld [vmem:[%s1522_s1 + $0xe0] sm:$0xff]  ;;  %v285_v39 = vld [vmem:[%s1522_s1 + $0xd8] sm:$0xff] }
  0x18   : > { %325 = vmatprep.subr.mxu0 %v1042_v1  ;;  %914 = vmatpush3.msra.mxu1 %v300_v14  ;;  %v176_v40 = vld [vmem:[%s1202_s27 + $0x28] sm:$0xff]  ;;  %v284_v41 = vld [vmem:[%s1522_s1 + $0xd0] sm:$0xff]  ;;  %v179_v43 = vld [vmem:[%s1202_s27 + $0x40] sm:$0xff] }
  0x19   : > { %326 = vmatpush1.msra.mxu0 %v267_v11  ;;  %915 = vmatprep.subr.mxu1 %v1042_v1  ;;  %v283_v42 = vld [vmem:[%s1522_s1 + $0xc8] sm:$0xff]  ;;  %v282_v44 = vld [vmem:[%s1522_s1 + $0xc0] sm:$0xff]  ;;  %v281_v45 = vld [vmem:[%s1522_s1 + $0xb8] sm:$0xff] }
  0x1a   : > { %327 = vmatprep.subr.mxu0 %v1042_v1  ;;  %916 = vmatpush3.msra.mxu1 %v299_v16  ;;  %v182_v46 = vld [vmem:[%s1202_s27 + $0x58] sm:$0xff]  ;;  %v280_v47 = vld [vmem:[%s1522_s1 + $0xb0] sm:$0xff]  ;;  %v279_v48 = vld [vmem:[%s1522_s1 + $0xa8] sm:$0xff] }
  0x1b   : > { %328 = vmatpush1.msra.mxu0 %v266_v13  ;;  %917 = vmatprep.subr.mxu1 %v1042_v1  ;;  %v185_v49 = vld [vmem:[%s1202_s27 + $0x70] sm:$0xff]  ;;  %v278_v50 = vld [vmem:[%s1522_s1 + $0xa0] sm:$0xff]  ;;  %v277_v51 = vld [vmem:[%s1522_s1 + $0x98] sm:$0xff] }
  0x1c   : > { %329 = vmatprep.subr.mxu0 %v1042_v1  ;;  %918 = vmatpush3.msra.mxu1 %v298_v18  ;;  %v188_v52 = vld [vmem:[%s1202_s27 + $0x88] sm:$0xff]  ;;  %v276_v53 = vld [vmem:[%s1522_s1 + $0x90] sm:$0xff]  ;;  %v191_v55 = vld [vmem:[%s1202_s27 + $0xa0] sm:$0xff] }
  0x1d   : > { %330 = vmatpush1.msra.mxu0 %v265_v15  ;;  %919 = vmatprep.subr.mxu1 %v1042_v1  ;;  %v275_v54 = vld [vmem:[%s1522_s1 + $0x88] sm:$0xff]  ;;  %v274_v56 = vld [vmem:[%s1522_s1 + $0x80] sm:$0xff]  ;;  %v194_v59 = vld [vmem:[%s1202_s27 + $0xb8] sm:$0xff] }
  0x1e   : > { %331 = vmatprep.subr.mxu0 %v1042_v1  ;;  %920 = vmatpush3.msra.mxu1 %v297_v20  ;;  %v171_v57 = vld [vmem:[%s1202_s27] sm:$0xff]  ;;  %v174_v60 = vld [vmem:[%s1202_s27 + $0x18] sm:$0xff]  ;;  %v197_v62 = vld [vmem:[%s1202_s27 + $0xd0] sm:$0xff] }
  0x1f   : > { %332 = vmatpush1.msra.mxu0 %v264_v17  ;;  %921 = vmatprep.subr.mxu1 %v1042_v1  ;;  %v175_v58 = vld [vmem:[%s1202_s27 + $0x20] sm:$0xff]  ;;  %v178_v61 = vld [vmem:[%s1202_s27 + $0x38] sm:$0xff]  ;;  %v177_v63 = vld [vmem:[%s1202_s27 + $0x30] sm:$0xff] }
  0x20   : > { %333 = vmatprep.subr.mxu0 %v1042_v1  ;;  %922 = vmatpush3.msra.mxu1 %v296_v22  ;;  %v181_v0 = vld [vmem:[%s1202_s27 + $0x50] sm:$0xff]  ;;  %v200_v2 = vld [vmem:[%s1202_s27 + $0xe8] sm:$0xff]  ;;  %v203_v5 = vld [vmem:[%s1202_s27 + $0x100] sm:$0xff] }
  0x21   : > { %334 = vmatpush1.msra.mxu0 %v263_v19  ;;  %923 = vmatprep.subr.mxu1 %v1042_v1  ;;  %v180_v3 = vld [vmem:[%s1202_s27 + $0x48] sm:$0xff]  ;;  %v183_v6 = vld [vmem:[%s1202_s27 + $0x60] sm:$0xff]  ;;  %v206_v8 = vld [vmem:[%s1202_s27 + $0x118] sm:$0xff] }
  0x22   : > { %335 = vmatprep.subr.mxu0 %v1042_v1  ;;  %924 = vmatpush3.msra.mxu1 %v295_v24  ;;  %v184_v4 = vld [vmem:[%s1202_s27 + $0x68] sm:$0xff]  ;;  %v187_v7 = vld [vmem:[%s1202_s27 + $0x80] sm:$0xff]  ;;  %v186_v9 = vld [vmem:[%s1202_s27 + $0x78] sm:$0xff] }
  0x23   : > { %336 = vmatpush1.msra.mxu0 %v262_v21  ;;  %925 = vmatprep.subr.mxu1 %v1042_v1  ;;  %v190_v10 = vld [vmem:[%s1202_s27 + $0x98] sm:$0xff]  ;;  %v209_v11 = vld [vmem:[%s1202_s27 + $0x130] sm:$0xff]  ;;  %v212_v14 = vld [vmem:[%s1202_s27 + $0x148] sm:$0xff] }
  0x24   : > { %337 = vmatprep.subr.mxu0 %v1042_v1  ;;  %926 = vmatpush3.msra.mxu1 %v294_v26  ;;  %v189_v12 = vld [vmem:[%s1202_s27 + $0x90] sm:$0xff]  ;;  %v192_v15 = vld [vmem:[%s1202_s27 + $0xa8] sm:$0xff]  ;;  %v215_v17 = vld [vmem:[%s1202_s27 + $0x160] sm:$0xff] }
  0x25   : > { %338 = vmatpush1.msra.mxu0 %v261_v23  ;;  %927 = vmatprep.subr.mxu1 %v1042_v1  ;;  %v193_v13 = vld [vmem:[%s1202_s27 + $0xb0] sm:$0xff]  ;;  %v196_v16 = vld [vmem:[%s1202_s27 + $0xc8] sm:$0xff]  ;;  %v195_v18 = vld [vmem:[%s1202_s27 + $0xc0] sm:$0xff] }
  0x26   : > { %339 = vmatprep.subr.mxu0 %v1042_v1  ;;  %928 = vmatpush3.msra.mxu1 %v293_v28  ;;  %v199_v19 = vld [vmem:[%s1202_s27 + $0xe0] sm:$0xff]  ;;  %v218_v20 = vld [vmem:[%s1202_s27 + $0x178] sm:$0xff]  ;;  %v221_v23 = vld [vmem:[%s1202_s27 + $0x190] sm:$0xff] }
  0x27   : > { %340 = vmatpush1.msra.mxu0 %v260_v25  ;;  %929 = vmatprep.subr.mxu1 %v1042_v1  ;;  %v198_v21 = vld [vmem:[%s1202_s27 + $0xd8] sm:$0xff]  ;;  %v201_v24 = vld [vmem:[%s1202_s27 + $0xf0] sm:$0xff]  ;;  %v224_v26 = vld [vmem:[%s1202_s27 + $0x1a8] sm:$0xff] }
  0x28   : > { %341 = vmatprep.subr.mxu0 %v1042_v1  ;;  %930 = vmatpush3.msra.mxu1 %v292_v30  ;;  %v202_v22 = vld [vmem:[%s1202_s27 + $0xf8] sm:$0xff]  ;;  %v205_v25 = vld [vmem:[%s1202_s27 + $0x110] sm:$0xff]  ;;  %v208_v28 = vld [vmem:[%s1202_s27 + $0x128] sm:$0xff] }
  0x29   : > { %342 = vmatpush1.msra.mxu0 %v259_v27  ;;  %931 = vmatprep.subr.mxu1 %v1042_v1  ;;  %v204_v27 = vld [vmem:[%s1202_s27 + $0x108] sm:$0xff]  ;;  %v207_v30 = vld [vmem:[%s1202_s27 + $0x120] sm:$0xff] }
  0x2a   : > { %343 = vmatprep.subr.mxu0 %v1042_v1  ;;  %932 = vmatpush3.msra.mxu1 %v291_v32  ;;  %v230_v32 = vld [vmem:[%s1202_s27 + $0x1d8] sm:$0xff] }
  0x2b   : > { %344 = vmatpush1.msra.mxu0 %v258_v29  ;;  %933 = vmatprep.subr.mxu1 %v1042_v1  ;;  %v227_v29 = vld [vmem:[%s1202_s27 + $0x1c0] sm:$0xff] }
  0x2c   : > { %345 = vmatprep.subr.mxu0 %v1042_v1  ;;  %377 = vmatprep.mubr.f32.mxu0 %v172_v34  ;;  %v214_v34 = vld [vmem:[%s1202_s27 + $0x158] sm:$0xff] }
  0x2d   : > { %346 = vmatpush2.msra.mxu0 %v289_v31  ;;  %934 = vmatpush3.msra.mxu1 %v290_v35  ;;  %v211_v31 = vld [vmem:[%s1202_s27 + $0x140] sm:$0xff]  ;;  %v233_v35 = vld [vmem:[%s1202_s27 + $0x1f0] sm:$0xff] }
  0x2e   : > { %347 = vmatprep.subr.mxu0 %v1042_v1  ;;  %936 = vmatmul.mubr.f32.vlgmr.msra.gmra.mxu1 %v173_v37  ;;  %v217_v37 = vld [vmem:[%s1202_s27 + $0x170] sm:$0xff] }
  0x2f   : > { %348 = vmatpush2.msra.mxu0 %v288_v33  ;;  %938 = vmatprep.mubr.msk.f32.mxu1 %vm1043_vm0, %v1042_v1  ;;  %v210_v33 = vld [vmem:[%s1202_s27 + $0x138] sm:$0xff] }
  0x30   : > { %349 = vmatprep.subr.mxu0 %v1042_v1 }
  0x31   : > { %350 = vmatpush2.msra.mxu0 %v287_v36  ;;  %v213_v36 = vld [vmem:[%s1202_s27 + $0x150] sm:$0xff] }
  0x32   : > { %351 = vmatprep.subr.mxu0 %v1042_v1  ;;  %939 = vmatmul.mubr.f32.gmra.mxu1 %v176_v40  ;;  %v220_v40 = vld [vmem:[%s1202_s27 + $0x188] sm:$0xff] }
  0x33   : > { %352 = vmatpush2.msra.mxu0 %v286_v38  ;;  %941 = vmatprep.mubr.msk.f32.mxu1 %vm1043_vm0, %v1042_v1  ;;  %v236_v38 = vld [vmem:[%s1202_s27 + $0x208] sm:$0xff] }
  0x34   : > { %353 = vmatprep.subr.mxu0 %v1042_v1 }
  0x35   : > { %354 = vmatpush2.msra.mxu0 %v285_v39  ;;  %v216_v39 = vld [vmem:[%s1202_s27 + $0x168] sm:$0xff] }
  0x36   : > { %355 = vmatprep.subr.mxu0 %v1042_v1  ;;  %942 = vmatmul.mubr.f32.gmra.mxu1 %v179_v43  ;;  %v223_v43 = vld [vmem:[%s1202_s27 + $0x1a0] sm:$0xff] }
  0x37   : > { %356 = vmatpush2.msra.mxu0 %v284_v41  ;;  %944 = vmatprep.mubr.msk.f32.mxu1 %vm1043_vm0, %v1042_v1  ;;  %v239_v41 = vld [vmem:[%s1202_s27 + $0x220] sm:$0xff] }
  0x38   : > { %357 = vmatprep.subr.mxu0 %v1042_v1 }
  0x39   : > { %358 = vmatpush2.msra.mxu0 %v283_v42  ;;  %v219_v42 = vld [vmem:[%s1202_s27 + $0x180] sm:$0xff] }
  0x3a   : > { %359 = vmatprep.subr.mxu0 %v1042_v1  ;;  %945 = vmatmul.mubr.f32.gmra.mxu1 %v182_v46  ;;  %v226_v46 = vld [vmem:[%s1202_s27 + $0x1b8] sm:$0xff] }
  0x3b   : > { %360 = vmatpush2.msra.mxu0 %v282_v44  ;;  %947 = vmatprep.mubr.msk.f32.mxu1 %vm1043_vm0, %v1042_v1  ;;  %v242_v44 = vld [vmem:[%s1202_s27 + $0x238] sm:$0xff] }
  0x3c   : > { %361 = vmatprep.subr.mxu0 %v1042_v1 }
  0x3d   : > { %362 = vmatpush2.msra.mxu0 %v281_v45  ;;  %v222_v45 = vld [vmem:[%s1202_s27 + $0x198] sm:$0xff] }
  0x3e   : > { %363 = vmatprep.subr.mxu0 %v1042_v1  ;;  %948 = vmatmul.mubr.f32.gmra.mxu1 %v185_v49  ;;  %v229_v49 = vld [vmem:[%s1202_s27 + $0x1d0] sm:$0xff] }
  0x3f   : > { %364 = vmatpush2.msra.mxu0 %v280_v47  ;;  %950 = vmatprep.mubr.msk.f32.mxu1 %vm1043_vm0, %v1042_v1  ;;  %v245_v47 = vld [vmem:[%s1202_s27 + $0x250] sm:$0xff] }
  0x40   : > { %365 = vmatprep.subr.mxu0 %v1042_v1 }
  0x41   : > { %366 = vmatpush2.msra.mxu0 %v279_v48  ;;  %v225_v48 = vld [vmem:[%s1202_s27 + $0x1b0] sm:$0xff] }
  0x42   : > { %367 = vmatprep.subr.mxu0 %v1042_v1  ;;  %951 = vmatmul.mubr.f32.gmra.mxu1 %v188_v52  ;;  %v232_v52 = vld [vmem:[%s1202_s27 + $0x1e8] sm:$0xff] }
  0x43   : > { %368 = vmatpush2.msra.mxu0 %v278_v50  ;;  %953 = vmatprep.mubr.msk.f32.mxu1 %vm1043_vm0, %v1042_v1  ;;  %v248_v50 = vld [vmem:[%s1202_s27 + $0x268] sm:$0xff] }
  0x44   : > { %369 = vmatprep.subr.mxu0 %v1042_v1 }
  0x45   : > { %370 = vmatpush2.msra.mxu0 %v277_v51  ;;  %v228_v51 = vld [vmem:[%s1202_s27 + $0x1c8] sm:$0xff] }
  0x46   : > { %371 = vmatprep.subr.mxu0 %v1042_v1  ;;  %954 = vmatmul.mubr.f32.gmra.mxu1 %v191_v55  ;;  %v235_v55 = vld [vmem:[%s1202_s27 + $0x200] sm:$0xff] }
  0x47   : > { %372 = vmatpush2.msra.mxu0 %v276_v53  ;;  %956 = vmatprep.mubr.msk.f32.mxu1 %vm1043_vm0, %v1042_v1  ;;  %v251_v53 = vld [vmem:[%s1202_s27 + $0x280] sm:$0xff] }
  0x48   : > { %373 = vmatprep.subr.mxu0 %v1042_v1 }
  0x49   : > { %374 = vmatpush2.msra.mxu0 %v275_v54  ;;  %v231_v54 = vld [vmem:[%s1202_s27 + $0x1e0] sm:$0xff] }
  0x4a   : > { %375 = vmatprep.subr.mxu0 %v1042_v1  ;;  %957 = vmatmul.mubr.f32.gmra.mxu1 %v194_v59  ;;  %v257_v59 = vld [vmem:[%s1202_s27 + $0x2b0] sm:$0x1] }
  0x4b   : > { %376 = vmatpush2.msra.mxu0 %v274_v56  ;;  %959 = vmatprep.mubr.msk.f32.mxu1 %vm1043_vm0, %v1042_v1  ;;  %v254_v56 = vld [vmem:[%s1202_s27 + $0x298] sm:$0xff] }
  0x4c   : > { %378 = vmatmul.mubr.f32.vlgmr.msra.gmra.mxu0 %v171_v57  ;;  %v234_v57 = vld [vmem:[%s1202_s27 + $0x1f8] sm:$0xff] }
  0x4d   : > { %382 = vmatprep.mubr.f32.mxu0 %v175_v58  ;;  %v238_v58 = vld [vmem:[%s1202_s27 + $0x218] sm:$0xff] }
  0x4e   : > { %960 = vmatmul.mubr.f32.gmra.mxu1 %v197_v62  ;;  %v240_v62 = vld [vmem:[%s1202_s27 + $0x228] sm:$0xff] }
  0x4f   : > { %962 = vmatprep.mubr.msk.f32.mxu1 %vm1043_vm0, %v1042_v1 }
  0x50   : > { %383 = vmatmul.mubr.f32.gmra.mxu0 %v174_v60  ;;  %v237_v60 = vld [vmem:[%s1202_s27 + $0x210] sm:$0xff] }
  0x51   : > { %387 = vmatprep.mubr.f32.mxu0 %v178_v61  ;;  %v241_v61 = vld [vmem:[%s1202_s27 + $0x230] sm:$0xff] }
  0x52   : > { %963 = vmatmul.mubr.f32.gmra.mxu1 %v200_v2  ;;  %v246_v2 = vld [vmem:[%s1202_s27 + $0x258] sm:$0xff] }
  0x53   : > { %965 = vmatprep.mubr.msk.f32.mxu1 %vm1043_vm0, %v1042_v1 }
  0x54   : > { %388 = vmatmul.mubr.f32.gmra.mxu0 %v177_v63  ;;  %v244_v63 = vld [vmem:[%s1202_s27 + $0x248] sm:$0xff] }
  0x55   : > { %392 = vmatprep.mubr.f32.mxu0 %v181_v0  ;;  %v243_v0 = vld [vmem:[%s1202_s27 + $0x240] sm:$0xff] }
  0x56   : > { %966 = vmatmul.mubr.f32.gmra.mxu1 %v203_v5  ;;  %v253_v5 = vld [vmem:[%s1202_s27 + $0x290] sm:$0xff] }
  0x57   : > { %968 = vmatprep.mubr.msk.f32.mxu1 %vm1043_vm0, %v1042_v1 }
  0x58   : > { %393 = vmatmul.mubr.f32.gmra.mxu0 %v180_v3  ;;  %v250_v3 = vld [vmem:[%s1202_s27 + $0x278] sm:$0xff] }
  0x59   : > { %397 = vmatprep.mubr.f32.mxu0 %v184_v4  ;;  %v249_v4 = vld [vmem:[%s1202_s27 + $0x270] sm:$0xff] }
  0x5a   : > { %969 = vmatmul.mubr.f32.gmra.mxu1 %v206_v8  ;;  %v255_v8 = vld [vmem:[%s1202_s27 + $0x2a0] sm:$0x1] }
  0x5b   : > { %971 = vmatprep.mubr.msk.f32.mxu1 %vm1043_vm0, %v1042_v1 }
  0x5c   : > { %398 = vmatmul.mubr.f32.gmra.mxu0 %v183_v6  ;;  %v252_v6 = vld [vmem:[%s1202_s27 + $0x288] sm:$0xff] }
  0x5d   : > { %402 = vmatprep.mubr.f32.mxu0 %v187_v7  ;;  %v256_v7 = vld [vmem:[%s1202_s27 + $0x2a8] sm:$0x1] }
  0x5e   : > { %972 = vmatmul.mubr.f32.gmra.mxu1 %v209_v11 }
  0x5f   : > { %974 = vmatprep.mubr.msk.f32.mxu1 %vm1043_vm0, %v1042_v1 }
  0x60   : > { %403 = vmatmul.mubr.f32.gmra.mxu0 %v186_v9 }
  0x61   : > { %407 = vmatprep.mubr.f32.mxu0 %v190_v10 }
  0x62   : > { %975 = vmatmul.mubr.f32.gmra.mxu1 %v212_v14 }
  0x63   : > { %977 = vmatprep.mubr.msk.f32.mxu1 %vm1043_vm0, %v1042_v1 }
  0x64   : > { %408 = vmatmul.mubr.f32.gmra.mxu0 %v189_v12 }
  0x65   : > { %412 = vmatprep.mubr.f32.mxu0 %v193_v13 }
  0x66   : > { %978 = vmatmul.mubr.f32.gmra.mxu1 %v215_v17 }
  0x67   : > { %980 = vmatprep.mubr.msk.f32.mxu1 %vm1043_vm0, %v1042_v1 }
  0x68   : > { %413 = vmatmul.mubr.f32.gmra.mxu0 %v192_v15 }
  0x69   : > { %417 = vmatprep.mubr.f32.mxu0 %v196_v16 }
  0x6a   : > { %981 = vmatmul.mubr.f32.gmra.mxu1 %v218_v20 }
  0x6b   : > { %983 = vmatprep.mubr.msk.f32.mxu1 %vm1043_vm0, %v1042_v1 }
  0x6c   : > { %418 = vmatmul.mubr.f32.gmra.mxu0 %v195_v18 }
  0x6d   : > { %422 = vmatprep.mubr.f32.mxu0 %v199_v19 }
  0x6e   : > { %984 = vmatmul.mubr.f32.gmra.mxu1 %v221_v23 }
  0x6f   : > { %986 = vmatprep.mubr.msk.f32.mxu1 %vm1043_vm0, %v1042_v1 }
  0x70   : > { %423 = vmatmul.mubr.f32.gmra.mxu0 %v198_v21 }
  0x71   : > { %427 = vmatprep.mubr.f32.mxu0 %v202_v22  ;;  %v1424_v22 = vld [vmem:[%s1523_s2] ss:$0 sm:$0xff] }
  0x72   : > { %987 = vmatmul.mubr.f32.gmra.mxu1 %v224_v26 }
  0x73   : > { %989 = vmatprep.mubr.msk.f32.mxu1 %vm1043_vm0, %v1042_v1 }
  0x74   : > { %428 = vmatmul.mubr.f32.gmra.mxu0 %v201_v24 }
  0x75   : > { %432 = vmatprep.mubr.f32.mxu0 %v205_v25 }
  0x76   : > { %990 = vmatmul.mubr.f32.gmra.mxu1 %v227_v29 }
  0x77   : > { %992 = vmatprep.mubr.msk.f32.mxu1 %vm1043_vm0, %v1042_v1 }
  0x78   : > { %433 = vmatmul.mubr.f32.gmra.mxu0 %v204_v27 }
  0x79   : > { %437 = vmatprep.mubr.f32.mxu0 %v208_v28 }
  0x7a   : > { %993 = vmatmul.mubr.f32.gmra.mxu1 %v230_v32 }
  0x7b   : > { %995 = vmatprep.mubr.msk.f32.mxu1 %vm1043_vm0, %v1042_v1 }
  0x7c   : > { %438 = vmatmul.mubr.f32.gmra.mxu0 %v207_v30 }
  0x7d   : > { %442 = vmatprep.mubr.f32.mxu0 %v211_v31 }
  0x7e   : > { %996 = vmatmul.mubr.f32.gmra.mxu1 %v233_v35 }
  0x7f   : > { %998 = vmatprep.mubr.msk.f32.mxu1 %vm1043_vm0, %v1042_v1 }
  0x80   : > { %443 = vmatmul.mubr.f32.gmra.mxu0 %v210_v33 }
  0x81   : > { %447 = vmatprep.mubr.f32.mxu0 %v214_v34 }
  0x82   : > { %999 = vmatmul.mubr.f32.gmra.mxu1 %v236_v38 }
  0x83   : > { %1001 = vmatprep.mubr.msk.f32.mxu1 %vm1043_vm0, %v1042_v1 }
  0x84   : > { %448 = vmatmul.mubr.f32.gmra.mxu0 %v213_v36 }
  0x85   : > { %452 = vmatprep.mubr.f32.mxu0 %v217_v37 }
  0x86   : > { %1002 = vmatmul.mubr.f32.gmra.mxu1 %v239_v41 }
  0x87   : > { %1004 = vmatprep.mubr.msk.f32.mxu1 %vm1043_vm0, %v1042_v1 }
  0x88   : > { %453 = vmatmul.mubr.f32.gmra.mxu0 %v216_v39 }
  0x89   : > { %457 = vmatprep.mubr.f32.mxu0 %v220_v40 }
  0x8a   : > { %1005 = vmatmul.mubr.f32.gmra.mxu1 %v242_v44 }
  0x8b   : > { %1007 = vmatprep.mubr.msk.f32.mxu1 %vm1043_vm0, %v1042_v1 }
  0x8c   : > { %458 = vmatmul.mubr.f32.gmra.mxu0 %v219_v42 }
  0x8d   : > { %462 = vmatprep.mubr.f32.mxu0 %v223_v43 }
  0x8e   : > { %1008 = vmatmul.mubr.f32.gmra.mxu1 %v245_v47 }
  0x8f   : > { %1010 = vmatprep.mubr.msk.f32.mxu1 %vm1043_vm0, %v1042_v1 }
  0x90   : > { %463 = vmatmul.mubr.f32.gmra.mxu0 %v222_v45 }
  0x91   : > { %467 = vmatprep.mubr.f32.mxu0 %v226_v46 }
  0x92   : > { %1011 = vmatmul.mubr.f32.gmra.mxu1 %v248_v50 }
  0x93   : > { %1013 = vmatprep.mubr.msk.f32.mxu1 %vm1043_vm0, %v1042_v1 }
  0x94   : > { %468 = vmatmul.mubr.f32.gmra.mxu0 %v225_v48 }
  0x95   : > { %472 = vmatprep.mubr.f32.mxu0 %v229_v49 }
  0x96   : > { %1014 = vmatmul.mubr.f32.gmra.mxu1 %v251_v53 }
  0x97   : > { %1016 = vmatprep.mubr.msk.f32.mxu1 %vm1043_vm0, %v1042_v1 }
  0x98   : > { %473 = vmatmul.mubr.f32.gmra.mxu0 %v228_v51 }
  0x99   : > { %477 = vmatprep.mubr.f32.mxu0 %v232_v52 }
  0x9a   : > { %1017 = vmatmul.mubr.f32.gmra.mxu1 %v254_v56 }
  0x9b   : > { %1019 = vmatprep.mubr.msk.f32.mxu1 %vm1043_vm0, %v1042_v1  ;;  %v247_v1 = vld [vmem:[%s1202_s27 + $0x260] sm:$0xff]  ;;  %s1023_s27 = smul.u32 232, %s1526_s13 }
  0x9c   : > { %478 = vmatmul.mubr.f32.gmra.mxu0 %v231_v54 }
  0x9d   : > { %482 = vmatprep.mubr.f32.mxu0 %v235_v55  ;;  %s1431_s19 = scalar_lea.vmem %s1524_s3, %s1023_s27 }
  0x9e   : > { %1020 = vmatmul.mubr.f32.gmra.mxu1 %v257_v59 }
  0xa0   : > { %483 = vmatmul.mubr.f32.gmra.mxu0 %v234_v57 }
  0xa1   : > { %487 = vmatprep.mubr.f32.mxu0 %v238_v58 }
  0xa4   : > { %488 = vmatmul.mubr.f32.gmra.mxu0 %v237_v60 }
  0xa5   : > { %492 = vmatprep.mubr.f32.mxu0 %v241_v61 }
  0xa8   : > { %493 = vmatmul.mubr.f32.gmra.mxu0 %v240_v62 }
  0xa9   : > { %497 = vmatprep.mubr.f32.mxu0 %v244_v63 }
  0xac   : > { %498 = vmatmul.mubr.f32.gmra.mxu0 %v243_v0 }
  0xad   : > { %502 = vmatprep.mubr.f32.mxu0 %v247_v1 }
  0xb0   : > { %503 = vmatmul.mubr.f32.gmra.mxu0 %v246_v2 }
  0xb1   : > { %507 = vmatprep.mubr.f32.mxu0 %v250_v3 }
  0xb4   : > { %508 = vmatmul.mubr.f32.gmra.mxu0 %v249_v4 }
  0xb5   : > { %512 = vmatprep.mubr.f32.mxu0 %v253_v5 }
  0xb8   : > { %513 = vmatmul.mubr.f32.gmra.mxu0 %v252_v6 }
  0xb9   : > { %517 = vmatprep.mubr.f32.mxu0 %v256_v7 }
  0xbc   : > { %518 = vmatmul.mubr.f32.gmra.mxu0 %v255_v8 }
  0xee   : > { %v589_v9 = vpop.f32.mrf.mxu1 }
  0xf0   : > { %v937_v10 = vpop.f32.mrf.mxu1 }
  0xf2   : > { %v594_v11 = vpop.f32.mrf.mxu1 }
  0xf4   : > { %v940_v12 = vpop.f32.mrf.mxu1 }
  0xf6   : > { %v599_v13 = vpop.f32.mrf.mxu1 }
  0xf8   : > { %v943_v14 = vpop.f32.mrf.mxu1 }
  0xfa   : > { %v604_v15 = vpop.f32.mrf.mxu1 }
  0xfc   : > { %v946_v16 = vpop.f32.mrf.mxu1 }
  0xfe   : > { %v609_v17 = vpop.f32.mrf.mxu1 }
 0x100   : > { %v949_v18 = vpop.f32.mrf.mxu1 }
 0x102   : > { %v614_v19 = vpop.f32.mrf.mxu1 }
 0x104   : > { %v952_v20 = vpop.f32.mrf.mxu1 }
 0x106   : > { %v619_v21 = vpop.f32.mrf.mxu1 }
 0x108   : > { %v955_v23 = vpop.f32.mrf.mxu1 }
 0x10a   : > { %v624_v26 = vpop.f32.mrf.mxu1 }
 0x10c   : > { %v379_v24 = vpop.f32.mrf.mxu0  ;;  %v958_v29 = vpop.f32.mrf.mxu1 }
 0x10d   : > { %v380_v25 = vadd.f32 %v1424_v22, %v379_v24 }
 0x10e   : > { %v381_v27 = vpop.f32.mrf.mxu0  ;;  %v629_v33 = vpop.f32.mrf.mxu1 }
 0x10f   : > { %v590_v28 = vadd.f32 %v589_v9, %v380_v25 }
 0x110   : > { %v384_v30 = vpop.f32.mrf.mxu0  ;;  %v961_v36 = vpop.f32.mrf.mxu1 }
 0x111   : > { %v733_v31 = vmax.f32 %v590_v28, 0.0  ;;  %v385_v32 = vadd.f32 %v1424_v22, %v384_v30 }
 0x112   : > { %v386_v34 = vpop.f32.mrf.mxu0  ;;  %v634_v40 = vpop.f32.mrf.mxu1 }
 0x113   : > { %763 = vst.msk [vmem:[%s1431_s19] sm:$0xff] %vm762_vm1, %v733_v31  ;;  %v595_v35 = vadd.f32 %v594_v11, %v385_v32 }
 0x114   : > { %v389_v37 = vpop.f32.mrf.mxu0  ;;  %v964_v43 = vpop.f32.mrf.mxu1 }
 0x115   : > { %v734_v38 = vmax.f32 %v595_v35, 0.0  ;;  %v390_v39 = vadd.f32 %v1424_v22, %v389_v37 }
 0x116   : > { %v391_v41 = vpop.f32.mrf.mxu0  ;;  %v639_v47 = vpop.f32.mrf.mxu1 }
 0x117   : > { %764 = vst.msk [vmem:[%s1431_s19 + $0x8] sm:$0xff] %vm762_vm1, %v734_v38  ;;  %v600_v42 = vadd.f32 %v599_v13, %v390_v39 }
 0x118   : > { %v394_v44 = vpop.f32.mrf.mxu0  ;;  %v967_v50 = vpop.f32.mrf.mxu1 }
 0x119   : > { %v735_v45 = vmax.f32 %v600_v42, 0.0  ;;  %v395_v46 = vadd.f32 %v1424_v22, %v394_v44 }
 0x11a   : > { %v396_v48 = vpop.f32.mrf.mxu0  ;;  %v644_v54 = vpop.f32.mrf.mxu1 }
 0x11b   : > { %765 = vst.msk [vmem:[%s1431_s19 + $0x10] sm:$0xff] %vm762_vm1, %v735_v45  ;;  %v605_v49 = vadd.f32 %v604_v15, %v395_v46 }
 0x11c   : > { %v399_v51 = vpop.f32.mrf.mxu0  ;;  %v970_v57 = vpop.f32.mrf.mxu1 }
 0x11d   : > { %v736_v52 = vmax.f32 %v605_v49, 0.0  ;;  %v400_v53 = vadd.f32 %v1424_v22, %v399_v51 }
 0x11e   : > { %v401_v55 = vpop.f32.mrf.mxu0  ;;  %v649_v61 = vpop.f32.mrf.mxu1 }
 0x11f   : > { %766 = vst.msk [vmem:[%s1431_s19 + $0x18] sm:$0xff] %vm762_vm1, %v736_v52  ;;  %v610_v56 = vadd.f32 %v609_v17, %v400_v53 }
 0x120   : > { %v404_v58 = vpop.f32.mrf.mxu0  ;;  %v973_v0 = vpop.f32.mrf.mxu1 }
 0x121   : > { %v737_v59 = vmax.f32 %v610_v56, 0.0  ;;  %v405_v60 = vadd.f32 %v1424_v22, %v404_v58 }
 0x122   : > { %v406_v62 = vpop.f32.mrf.mxu0  ;;  %v654_v4 = vpop.f32.mrf.mxu1 }
 0x123   : > { %767 = vst.msk [vmem:[%s1431_s19 + $0x20] sm:$0xff] %vm762_vm1, %v737_v59  ;;  %v615_v63 = vadd.f32 %v614_v19, %v405_v60 }
 0x124   : > { %v409_v1 = vpop.f32.mrf.mxu0  ;;  %v976_v7 = vpop.f32.mrf.mxu1 }
 0x125   : > { %v738_v2 = vmax.f32 %v615_v63, 0.0  ;;  %v410_v3 = vadd.f32 %v1424_v22, %v409_v1 }
 0x126   : > { %v411_v5 = vpop.f32.mrf.mxu0  ;;  %v659_v11 = vpop.f32.mrf.mxu1 }
 0x127   : > { %768 = vst.msk [vmem:[%s1431_s19 + $0x28] sm:$0xff] %vm762_vm1, %v738_v2  ;;  %v620_v6 = vadd.f32 %v619_v21, %v410_v3 }
 0x128   : > { %v414_v8 = vpop.f32.mrf.mxu0  ;;  %v979_v14 = vpop.f32.mrf.mxu1 }
 0x129   : > { %v739_v9 = vmax.f32 %v620_v6, 0.0  ;;  %v415_v10 = vadd.f32 %v1424_v22, %v414_v8 }
 0x12a   : > { %v416_v12 = vpop.f32.mrf.mxu0  ;;  %v664_v18 = vpop.f32.mrf.mxu1 }
 0x12b   : > { %769 = vst.msk [vmem:[%s1431_s19 + $0x30] sm:$0xff] %vm762_vm1, %v739_v9  ;;  %v625_v13 = vadd.f32 %v624_v26, %v415_v10 }
 0x12c   : > { %v419_v15 = vpop.f32.mrf.mxu0  ;;  %v982_v21 = vpop.f32.mrf.mxu1 }
 0x12d   : > { %v740_v16 = vmax.f32 %v625_v13, 0.0  ;;  %v420_v17 = vadd.f32 %v1424_v22, %v419_v15 }
 0x12e   : > { %v421_v19 = vpop.f32.mrf.mxu0  ;;  %v669_v27 = vpop.f32.mrf.mxu1 }
 0x12f   : > { %770 = vst.msk [vmem:[%s1431_s19 + $0x38] sm:$0xff] %vm762_vm1, %v740_v16  ;;  %v630_v20 = vadd.f32 %v629_v33, %v420_v17 }
 0x130   : > { %v424_v23 = vpop.f32.mrf.mxu0  ;;  %v985_v29 = vpop.f32.mrf.mxu1 }
 0x131   : > { %v741_v24 = vmax.f32 %v630_v20, 0.0  ;;  %v425_v25 = vadd.f32 %v1424_v22, %v424_v23 }
 0x132   : > { %v426_v28 = vpop.f32.mrf.mxu0  ;;  %v674_v34 = vpop.f32.mrf.mxu1 }
 0x133   : > { %771 = vst.msk [vmem:[%s1431_s19 + $0x40] sm:$0xff] %vm762_vm1, %v741_v24  ;;  %v635_v26 = vadd.f32 %v634_v40, %v425_v25 }
 0x134   : > { %v429_v30 = vpop.f32.mrf.mxu0  ;;  %v988_v36 = vpop.f32.mrf.mxu1 }
 0x135   : > { %v742_v31 = vmax.f32 %v635_v26, 0.0  ;;  %v430_v32 = vadd.f32 %v1424_v22, %v429_v30 }
 0x136   : > { %v431_v35 = vpop.f32.mrf.mxu0  ;;  %v679_v41 = vpop.f32.mrf.mxu1 }
 0x137   : > { %772 = vst.msk [vmem:[%s1431_s19 + $0x48] sm:$0xff] %vm762_vm1, %v742_v31  ;;  %v640_v33 = vadd.f32 %v639_v47, %v430_v32 }
 0x138   : > { %v434_v37 = vpop.f32.mrf.mxu0  ;;  %v991_v43 = vpop.f32.mrf.mxu1 }
 0x139   : > { %v743_v38 = vmax.f32 %v640_v33, 0.0  ;;  %v435_v39 = vadd.f32 %v1424_v22, %v434_v37 }
 0x13a   : > { %v436_v42 = vpop.f32.mrf.mxu0  ;;  %v684_v48 = vpop.f32.mrf.mxu1 }
 0x13b   : > { %773 = vst.msk [vmem:[%s1431_s19 + $0x50] sm:$0xff] %vm762_vm1, %v743_v38  ;;  %v645_v40 = vadd.f32 %v644_v54, %v435_v39 }
 0x13c   : > { %v439_v44 = vpop.f32.mrf.mxu0  ;;  %v994_v50 = vpop.f32.mrf.mxu1 }
 0x13d   : > { %v744_v45 = vmax.f32 %v645_v40, 0.0  ;;  %v440_v46 = vadd.f32 %v1424_v22, %v439_v44 }
 0x13e   : > { %v441_v49 = vpop.f32.mrf.mxu0  ;;  %v689_v55 = vpop.f32.mrf.mxu1 }
 0x13f   : > { %774 = vst.msk [vmem:[%s1431_s19 + $0x58] sm:$0xff] %vm762_vm1, %v744_v45  ;;  %v650_v47 = vadd.f32 %v649_v61, %v440_v46 }
 0x140   : > { %v444_v51 = vpop.f32.mrf.mxu0  ;;  %v997_v57 = vpop.f32.mrf.mxu1 }
 0x141   : > { %v745_v52 = vmax.f32 %v650_v47, 0.0  ;;  %v445_v53 = vadd.f32 %v1424_v22, %v444_v51 }
 0x142   : > { %v446_v56 = vpop.f32.mrf.mxu0  ;;  %v694_v62 = vpop.f32.mrf.mxu1 }
 0x143   : > { %775 = vst.msk [vmem:[%s1431_s19 + $0x60] sm:$0xff] %vm762_vm1, %v745_v52  ;;  %v655_v54 = vadd.f32 %v654_v4, %v445_v53 }
 0x144   : > { %v449_v58 = vpop.f32.mrf.mxu0  ;;  %v1000_v0 = vpop.f32.mrf.mxu1 }
 0x145   : > { %v746_v59 = vmax.f32 %v655_v54, 0.0  ;;  %v450_v60 = vadd.f32 %v1424_v22, %v449_v58 }
 0x146   : > { %v451_v63 = vpop.f32.mrf.mxu0  ;;  %v699_v5 = vpop.f32.mrf.mxu1 }
 0x147   : > { %776 = vst.msk [vmem:[%s1431_s19 + $0x68] sm:$0xff] %vm762_vm1, %v746_v59  ;;  %v660_v61 = vadd.f32 %v659_v11, %v450_v60 }
 0x148   : > { %v454_v1 = vpop.f32.mrf.mxu0  ;;  %v1003_v7 = vpop.f32.mrf.mxu1 }
 0x149   : > { %v747_v2 = vmax.f32 %v660_v61, 0.0  ;;  %v455_v3 = vadd.f32 %v1424_v22, %v454_v1 }
 0x14a   : > { %v456_v6 = vpop.f32.mrf.mxu0  ;;  %v704_v12 = vpop.f32.mrf.mxu1 }
 0x14b   : > { %777 = vst.msk [vmem:[%s1431_s19 + $0x70] sm:$0xff] %vm762_vm1, %v747_v2  ;;  %v665_v4 = vadd.f32 %v664_v18, %v455_v3 }
 0x14c   : > { %v459_v8 = vpop.f32.mrf.mxu0  ;;  %v1006_v14 = vpop.f32.mrf.mxu1 }
 0x14d   : > { %v748_v9 = vmax.f32 %v665_v4, 0.0  ;;  %v460_v10 = vadd.f32 %v1424_v22, %v459_v8 }
 0x14e   : > { %v461_v13 = vpop.f32.mrf.mxu0  ;;  %v709_v19 = vpop.f32.mrf.mxu1 }
 0x14f   : > { %778 = vst.msk [vmem:[%s1431_s19 + $0x78] sm:$0xff] %vm762_vm1, %v748_v9  ;;  %v670_v11 = vadd.f32 %v669_v27, %v460_v10 }
 0x150   : > { %v464_v15 = vpop.f32.mrf.mxu0  ;;  %v1009_v21 = vpop.f32.mrf.mxu1 }
 0x151   : > { %v749_v16 = vmax.f32 %v670_v11, 0.0  ;;  %v465_v17 = vadd.f32 %v1424_v22, %v464_v15 }
 0x152   : > { %v466_v20 = vpop.f32.mrf.mxu0  ;;  %v714_v28 = vpop.f32.mrf.mxu1 }
 0x153   : > { %779 = vst.msk [vmem:[%s1431_s19 + $0x80] sm:$0xff] %vm762_vm1, %v749_v16  ;;  %v675_v18 = vadd.f32 %v674_v34, %v465_v17 }
 0x154   : > { %v469_v23 = vpop.f32.mrf.mxu0  ;;  %v1012_v29 = vpop.f32.mrf.mxu1 }
 0x155   : > { %v750_v24 = vmax.f32 %v675_v18, 0.0  ;;  %v470_v25 = vadd.f32 %v1424_v22, %v469_v23 }
 0x156   : > { %v471_v26 = vpop.f32.mrf.mxu0  ;;  %v719_v35 = vpop.f32.mrf.mxu1 }
 0x157   : > { %780 = vst.msk [vmem:[%s1431_s19 + $0x88] sm:$0xff] %vm762_vm1, %v750_v24  ;;  %v680_v27 = vadd.f32 %v679_v41, %v470_v25 }
 0x158   : > { %v474_v30 = vpop.f32.mrf.mxu0  ;;  %v1015_v36 = vpop.f32.mrf.mxu1 }
 0x159   : > { %v751_v31 = vmax.f32 %v680_v27, 0.0  ;;  %v475_v32 = vadd.f32 %v1424_v22, %v474_v30 }
 0x15a   : > { %v476_v33 = vpop.f32.mrf.mxu0  ;;  %v724_v42 = vpop.f32.mrf.mxu1 }
 0x15b   : > { %781 = vst.msk [vmem:[%s1431_s19 + $0x90] sm:$0xff] %vm762_vm1, %v751_v31  ;;  %v685_v34 = vadd.f32 %v684_v48, %v475_v32 }
 0x15c   : > { %v479_v37 = vpop.f32.mrf.mxu0  ;;  %v1018_v43 = vpop.f32.mrf.mxu1 }
 0x15d   : > { %v752_v38 = vmax.f32 %v685_v34, 0.0  ;;  %v480_v39 = vadd.f32 %v1424_v22, %v479_v37 }
 0x15e   : > { %v481_v40 = vpop.f32.mrf.mxu0  ;;  %v729_v49 = vpop.f32.mrf.mxu1 }
 0x15f   : > { %782 = vst.msk [vmem:[%s1431_s19 + $0x98] sm:$0xff] %vm762_vm1, %v752_v38  ;;  %v690_v41 = vadd.f32 %v689_v55, %v480_v39 }
 0x160   : > { %v484_v44 = vpop.f32.mrf.mxu0  ;;  %v1021_v50 = vpop.f32.mrf.mxu1 }
 0x161   : > { %v753_v45 = vmax.f32 %v690_v41, 0.0  ;;  %v485_v46 = vadd.f32 %v1424_v22, %v484_v44 }
 0x162   : > { %v486_v47 = vpop.f32.mrf.mxu0 }
 0x163   : > { %783 = vst.msk [vmem:[%s1431_s19 + $0xa0] sm:$0xff] %vm762_vm1, %v753_v45  ;;  %v695_v48 = vadd.f32 %v694_v62, %v485_v46 }
 0x164   : > { %v489_v51 = vpop.f32.mrf.mxu0 }
 0x165   : > { %v754_v52 = vmax.f32 %v695_v48, 0.0  ;;  %v490_v53 = vadd.f32 %v1424_v22, %v489_v51 }
 0x166   : > { %v491_v56 = vpop.f32.mrf.mxu0 }
 0x167   : > { %784 = vst.msk [vmem:[%s1431_s19 + $0xa8] sm:$0xff] %vm762_vm1, %v754_v52  ;;  %v700_v55 = vadd.f32 %v699_v5, %v490_v53 }
 0x168   : > { %v494_v54 = vpop.f32.mrf.mxu0 }
 0x169   : > { %v755_v57 = vmax.f32 %v700_v55, 0.0  ;;  %v495_v58 = vadd.f32 %v1424_v22, %v494_v54 }
 0x16a   : > { %v496_v59 = vpop.f32.mrf.mxu0 }
 0x16b   : > { %785 = vst.msk [vmem:[%s1431_s19 + $0xb0] sm:$0xff] %vm762_vm1, %v755_v57  ;;  %v705_v60 = vadd.f32 %v704_v12, %v495_v58 }
 0x16c   : > { %v499_v62 = vpop.f32.mrf.mxu0 }
 0x16d   : > { %v756_v63 = vmax.f32 %v705_v60, 0.0  ;;  %v500_v61 = vadd.f32 %v1424_v22, %v499_v62 }
 0x16e   : > { %v501_v0 = vpop.f32.mrf.mxu0 }
 0x16f   : > { %786 = vst.msk [vmem:[%s1431_s19 + $0xb8] sm:$0xff] %vm762_vm1, %v756_v63  ;;  %v710_v1 = vadd.f32 %v709_v19, %v500_v61 }
 0x170   : > { %v504_v2 = vpop.f32.mrf.mxu0 }
 0x171   : > { %v757_v3 = vmax.f32 %v710_v1, 0.0  ;;  %v505_v5 = vadd.f32 %v1424_v22, %v504_v2 }
 0x172   : > { %v506_v6 = vpop.f32.mrf.mxu0 }
 0x173   : > { %787 = vst.msk [vmem:[%s1431_s19 + $0xc0] sm:$0xff] %vm762_vm1, %v757_v3  ;;  %v715_v4 = vadd.f32 %v714_v28, %v505_v5 }
 0x174   : > { %v509_v7 = vpop.f32.mrf.mxu0 }
 0x175   : > { %v758_v8 = vmax.f32 %v715_v4, 0.0  ;;  %v510_v9 = vadd.f32 %v1424_v22, %v509_v7 }
 0x176   : > { %v511_v10 = vpop.f32.mrf.mxu0 }
 0x177   : > { %788 = vst.msk [vmem:[%s1431_s19 + $0xc8] sm:$0xff] %vm762_vm1, %v758_v8  ;;  %v720_v12 = vadd.f32 %v719_v35, %v510_v9 }
 0x178   : > { %v514_v13 = vpop.f32.mrf.mxu0 }
 0x179   : > { %v759_v11 = vmax.f32 %v720_v12, 0.0  ;;  %v515_v14 = vadd.f32 %v1424_v22, %v514_v13 }
 0x17a   : > { %v516_v15 = vpop.f32.mrf.mxu0 }
 0x17b   : > { %789 = vst.msk [vmem:[%s1431_s19 + $0xd0] sm:$0xff] %vm762_vm1, %v759_v11  ;;  %v725_v16 = vadd.f32 %v724_v42, %v515_v14 }
 0x17c   : > { %v519_v17 = vpop.f32.mrf.mxu0 }
 0x17d   : > { %v760_v19 = vmax.f32 %v725_v16, 0.0  ;;  %v520_v20 = vadd.f32 %v1424_v22, %v519_v17 }
 0x17e   : > { %v521_v18 = vpop.f32.mrf.mxu0 }
 0x17f   : > { %790 = vst.msk [vmem:[%s1431_s19 + $0xd8] sm:$0xff] %vm762_vm1, %v760_v19  ;;  %v730_v21 = vadd.f32 %v729_v49, %v520_v20 }
 0x181   : > { %v761_v23 = vmax.f32 %v730_v21, 0.0 }
 0x183   : > { %792 = vst.msk [vmem:[%s1431_s19 + $0xe0] sm:$0x1] %vm791_vm2, %v761_v23 }
 0x184 PF: > { %s13_s12 = sadd.s32 1, %s1040_s12  }
 0x185   : > { %p10_p4 = scmp.ge.s32.totalorder %s13_s12, 4  }
 0x187   :  { %12 = sbr.rel (!%p10_p4) target bundleno = 1 (0x1), region = 62 }

// kernel: actor_critic_forward.4
= control target key start
LH: loop header
LB: loop body
LE: loop exit
PB: predicated region body
PF: predicated region fallthrough
CT: control target
= control target key end

     0   :  { %s613_s12 = smov 0   ;;  %s853_s0 = inlined_call_operand.vmem [shape: f32[2,36,400], index: 0, kind: input, shape index: {}]   ;;  %s854_s1 = inlined_call_operand.vmem [shape: f32[400,32], index: 1, kind: input, shape index: {}]   ;;  %s855_s2 = inlined_call_operand.vmem [shape: f32[1,32], index: 2, kind: input, shape index: {}]   ;;  %s856_s3 = inlined_call_operand.vmem [shape: f32[2,36,32], index: 3, kind: output, shape index: {}]  }
   0x1 LB: > { %s511_s13 = sadd.s32 4294967295, %s590_s12   ;;  %p515_p0 = scmp.ge.s32.totalorder %s590_s12, 1  ;;  %s590_s12 = sphi %s613_s12, %s13_s12  }
   0x2   : > { %p137_p1 = scmp.lt.s32.totalorder %s590_s12, 3 }
   0x4   : > { %p138_p2 = pnand %p515_p0, %p137_p1 }
   0x5   : > { %p705_p3 = scmp.lt.s32.totalorder (!%p138_p2), %s511_s13, 1 }
   0x6   : > { %141 = sbr.rel (%p138_p2) target bundleno = 265 (0x109), region = 32 }
   0xb   : > { %v222_v0 = vld [vmem:[%s854_s1 + $0xf8] sm:$0xff]  ;;  %v592_v3 = vmov 0.0   ;;  %v221_v4 = vld [vmem:[%s854_s1 + $0xf0] sm:$0xff]  ;;  %v220_v7 = vld [vmem:[%s854_s1 + $0xe8] sm:$0xff]  ;;  %s859_s13 = smov (!%p705_p3, %s511_s13), 1  ;;  %vm248_vm0 = vcmask 130048  }
   0xc   : > { %v206_v1 = vld [vmem:[%s854_s1 + $0x78] sm:$0xff]  ;;  %526 = vmatprep.subr.mxu0 %v222_v0  ;;  %354 = vmatprep.subr.mxu1 %v592_v3  ;;  %v205_v5 = vld [vmem:[%s854_s1 + $0x70] sm:$0xff]  ;;  %v204_v8 = vld [vmem:[%s854_s1 + $0x68] sm:$0xff]  ;;  %s573_s14 = smul.u32 160, %s859_s13  ;;  %vm449_vm1 = vcmask 261120   ;;  %vm454_vm2 = vcmask 257024  }
   0xd   : > { %v238_v2 = vld [vmem:[%s854_s1 + $0x178] sm:$0xff]  ;;  %v237_v6 = vld [vmem:[%s854_s1 + $0x170] sm:$0xff]  ;;  %527 = vmatpush3.msra.mxu0 %v206_v1  ;;  %v236_v9 = vld [vmem:[%s854_s1 + $0x168] sm:$0xff]  ;;  %s574_s21 = smul.u32 40, %s859_s13 }
   0xe   : > { %355 = vmatpush1.msra.mxu1 %v238_v2  ;;  %528 = vmatprep.subr.mxu0 %v221_v4  ;;  %v219_v10 = vld [vmem:[%s854_s1 + $0xe0] sm:$0xff]  ;;  %v218_v13 = vld [vmem:[%s854_s1 + $0xd8] sm:$0xff]  ;;  %v217_v16 = vld [vmem:[%s854_s1 + $0xd0] sm:$0xff]  ;;  %s779_s29 = scalar_lea.vmem %s853_s0, %s573_s14 }
   0xf   : > { %356 = vmatprep.subr.mxu1 %v592_v3  ;;  %529 = vmatpush3.msra.mxu0 %v205_v5  ;;  %v203_v11 = vld [vmem:[%s854_s1 + $0x60] sm:$0xff]  ;;  %v202_v14 = vld [vmem:[%s854_s1 + $0x58] sm:$0xff]  ;;  %v201_v17 = vld [vmem:[%s854_s1 + $0x50] sm:$0xff]  ;;  %s839_s24 = scalar_lea.vmem %s856_s3, %s574_s21 }
  0x10   : > { %357 = vmatpush1.msra.mxu1 %v237_v6  ;;  %530 = vmatprep.subr.mxu0 %v220_v7  ;;  %v235_v12 = vld [vmem:[%s854_s1 + $0x160] sm:$0xff]  ;;  %v234_v15 = vld [vmem:[%s854_s1 + $0x158] sm:$0xff]  ;;  %v233_v18 = vld [vmem:[%s854_s1 + $0x150] sm:$0xff] }
  0x11   : > { %358 = vmatprep.subr.mxu1 %v592_v3  ;;  %531 = vmatpush3.msra.mxu0 %v204_v8  ;;  %v216_v19 = vld [vmem:[%s854_s1 + $0xc8] sm:$0xff]  ;;  %v215_v22 = vld [vmem:[%s854_s1 + $0xc0] sm:$0xff]  ;;  %v214_v25 = vld [vmem:[%s854_s1 + $0xb8] sm:$0xff] }
  0x12   : > { %359 = vmatpush1.msra.mxu1 %v236_v9  ;;  %532 = vmatprep.subr.mxu0 %v219_v10  ;;  %v200_v20 = vld [vmem:[%s854_s1 + $0x48] sm:$0xff]  ;;  %v199_v23 = vld [vmem:[%s854_s1 + $0x40] sm:$0xff]  ;;  %v198_v26 = vld [vmem:[%s854_s1 + $0x38] sm:$0xff] }
  0x13   : > { %360 = vmatprep.subr.mxu1 %v592_v3  ;;  %533 = vmatpush3.msra.mxu0 %v203_v11  ;;  %v232_v21 = vld [vmem:[%s854_s1 + $0x148] sm:$0xff]  ;;  %v231_v24 = vld [vmem:[%s854_s1 + $0x140] sm:$0xff]  ;;  %v230_v27 = vld [vmem:[%s854_s1 + $0x138] sm:$0xff] }
  0x14   : > { %361 = vmatpush1.msra.mxu1 %v235_v12  ;;  %534 = vmatprep.subr.mxu0 %v218_v13  ;;  %v213_v28 = vld [vmem:[%s854_s1 + $0xb0] sm:$0xff]  ;;  %v212_v31 = vld [vmem:[%s854_s1 + $0xa8] sm:$0xff]  ;;  %v211_v34 = vld [vmem:[%s854_s1 + $0xa0] sm:$0xff] }
  0x15   : > { %362 = vmatprep.subr.mxu1 %v592_v3  ;;  %535 = vmatpush3.msra.mxu0 %v202_v14  ;;  %v197_v29 = vld [vmem:[%s854_s1 + $0x30] sm:$0xff]  ;;  %v196_v32 = vld [vmem:[%s854_s1 + $0x28] sm:$0xff]  ;;  %v195_v35 = vld [vmem:[%s854_s1 + $0x20] sm:$0xff] }
  0x16   : > { %363 = vmatpush1.msra.mxu1 %v234_v15  ;;  %536 = vmatprep.subr.mxu0 %v217_v16  ;;  %v229_v30 = vld [vmem:[%s854_s1 + $0x130] sm:$0xff]  ;;  %v228_v33 = vld [vmem:[%s854_s1 + $0x128] sm:$0xff]  ;;  %v227_v36 = vld [vmem:[%s854_s1 + $0x120] sm:$0xff] }
  0x17   : > { %364 = vmatprep.subr.mxu1 %v592_v3  ;;  %537 = vmatpush3.msra.mxu0 %v201_v17  ;;  %v210_v37 = vld [vmem:[%s854_s1 + $0x98] sm:$0xff]  ;;  %v209_v40 = vld [vmem:[%s854_s1 + $0x90] sm:$0xff]  ;;  %v208_v43 = vld [vmem:[%s854_s1 + $0x88] sm:$0xff] }
  0x18   : > { %365 = vmatpush1.msra.mxu1 %v233_v18  ;;  %538 = vmatprep.subr.mxu0 %v216_v19  ;;  %v194_v38 = vld [vmem:[%s854_s1 + $0x18] sm:$0xff]  ;;  %v193_v41 = vld [vmem:[%s854_s1 + $0x10] sm:$0xff]  ;;  %v192_v44 = vld [vmem:[%s854_s1 + $0x8] sm:$0xff] }
  0x19   : > { %366 = vmatprep.subr.mxu1 %v592_v3  ;;  %539 = vmatpush3.msra.mxu0 %v200_v20  ;;  %v226_v39 = vld [vmem:[%s854_s1 + $0x118] sm:$0xff]  ;;  %v225_v42 = vld [vmem:[%s854_s1 + $0x110] sm:$0xff]  ;;  %v224_v45 = vld [vmem:[%s854_s1 + $0x108] sm:$0xff] }
  0x1a   : > { %367 = vmatpush1.msra.mxu1 %v232_v21  ;;  %540 = vmatprep.subr.mxu0 %v215_v22  ;;  %v207_v46 = vld [vmem:[%s854_s1 + $0x80] sm:$0xff]  ;;  %v172_v48 = vld [vmem:[%s779_s29 + $0x8] sm:$0xff]  ;;  %v174_v53 = vld [vmem:[%s779_s29 + $0x18] sm:$0xff] }
  0x1b   : > { %368 = vmatprep.subr.mxu1 %v592_v3  ;;  %541 = vmatpush3.msra.mxu0 %v199_v23  ;;  %v191_v47 = vld [vmem:[%s854_s1] sm:$0xff]  ;;  %v176_v51 = vld [vmem:[%s779_s29 + $0x28] sm:$0xff]  ;;  %v173_v56 = vld [vmem:[%s779_s29 + $0x10] sm:$0xff] }
  0x1c   : > { %369 = vmatpush1.msra.mxu1 %v231_v24  ;;  %542 = vmatprep.subr.mxu0 %v214_v25  ;;  %v223_v49 = vld [vmem:[%s854_s1 + $0x100] sm:$0xff]  ;;  %v240_v52 = vld [vmem:[%s854_s1 + $0x188] sm:$0xff]  ;;  %v178_v58 = vld [vmem:[%s779_s29 + $0x38] sm:$0xff] }
  0x1d   : > { %370 = vmatprep.subr.mxu1 %v592_v3  ;;  %543 = vmatpush3.msra.mxu0 %v198_v26  ;;  %v171_v50 = vld [vmem:[%s779_s29] sm:$0xff]  ;;  %v180_v57 = vld [vmem:[%s779_s29 + $0x48] sm:$0xff]  ;;  %v177_v60 = vld [vmem:[%s779_s29 + $0x30] sm:$0xff] }
  0x1e   : > { %371 = vmatpush1.msra.mxu1 %v230_v27  ;;  %544 = vmatprep.subr.mxu0 %v213_v28  ;;  %v239_v54 = vld [vmem:[%s854_s1 + $0x180] sm:$0xff]  ;;  %v184_v61 = vld [vmem:[%s779_s29 + $0x68] sm:$0xff]  ;;  %v182_v62 = vld [vmem:[%s779_s29 + $0x58] sm:$0xff] }
  0x1f   : > { %372 = vmatprep.subr.mxu1 %v592_v3  ;;  %545 = vmatpush3.msra.mxu0 %v197_v29  ;;  %v175_v55 = vld [vmem:[%s779_s29 + $0x20] sm:$0xff]  ;;  %v181_v0 = vld [vmem:[%s779_s29 + $0x50] sm:$0xff]  ;;  %v188_v1 = vld [vmem:[%s779_s29 + $0x88] sm:$0xf] }
  0x20   : > { %373 = vmatpush1.msra.mxu1 %v229_v30  ;;  %546 = vmatprep.subr.mxu0 %v212_v31  ;;  %v179_v59 = vld [vmem:[%s779_s29 + $0x40] sm:$0xff]  ;;  %v186_v2 = vld [vmem:[%s779_s29 + $0x78] sm:$0xff]  ;;  %v185_v4 = vld [vmem:[%s779_s29 + $0x70] sm:$0xff] }
  0x21   : > { %374 = vmatprep.subr.mxu1 %v592_v3  ;;  %547 = vmatpush3.msra.mxu0 %v196_v32  ;;  %v183_v63 = vld [vmem:[%s779_s29 + $0x60] sm:$0xff]  ;;  %v190_v5 = vld [vmem:[%s779_s29 + $0x98] sm:$0xf]  ;;  %v189_v6 = vld [vmem:[%s779_s29 + $0x90] sm:$0xf] }
  0x22   : > { %375 = vmatpush1.msra.mxu1 %v228_v33  ;;  %548 = vmatprep.subr.mxu0 %v211_v34  ;;  %v518_v9 = vld [vmem:[%s855_s2] ss:$0 sm:$0xff] }
  0x23   : > { %376 = vmatprep.subr.mxu1 %v592_v3  ;;  %549 = vmatpush3.msra.mxu0 %v195_v35 }
  0x24   : > { %377 = vmatpush1.msra.mxu1 %v227_v36  ;;  %550 = vmatprep.subr.mxu0 %v210_v37 }
  0x25   : > { %378 = vmatprep.subr.mxu1 %v592_v3  ;;  %551 = vmatpush3.msra.mxu0 %v194_v38 }
  0x26   : > { %379 = vmatpush1.msra.mxu1 %v226_v39  ;;  %552 = vmatprep.subr.mxu0 %v209_v40 }
  0x27   : > { %380 = vmatprep.subr.mxu1 %v592_v3  ;;  %553 = vmatpush3.msra.mxu0 %v193_v41 }
  0x28   : > { %381 = vmatpush1.msra.mxu1 %v225_v42  ;;  %554 = vmatprep.subr.mxu0 %v208_v43 }
  0x29   : > { %382 = vmatprep.subr.mxu1 %v592_v3  ;;  %555 = vmatpush3.msra.mxu0 %v192_v44 }
  0x2a   : > { %383 = vmatpush1.msra.mxu1 %v224_v45  ;;  %556 = vmatprep.subr.mxu0 %v207_v46 }
  0x2b   : > { %384 = vmatprep.subr.mxu1 %v592_v3  ;;  %557 = vmatpush3.msra.mxu0 %v191_v47 }
  0x2c   : > { %328 = vmatprep.mubr.f32.mxu0 %v172_v48  ;;  %385 = vmatpush1.msra.mxu1 %v223_v49 }
  0x2d   : > { %329 = vmatmul.mubr.f32.vlgmr.msra.gmra.mxu0 %v171_v50  ;;  %414 = vmatprep.subr.mxu1 %v592_v3 }
  0x2e   : > { %333 = vmatprep.mubr.f32.mxu0 %v176_v51  ;;  %415 = vmatpush2.msra.mxu1 %v240_v52 }
  0x2f   : > { %519 = vmatprep.mubr.msk.f32.mxu1 %vm248_vm0, %v174_v53  ;;  %416 = vmatprep.subr.mxu1 %v592_v3  ;;  %v187_v3 = vld [vmem:[%s779_s29 + $0x80] sm:$0xf] }
  0x30   : > { %417 = vmatpush2.msra.mxu1 %v239_v54 }
  0x31   : > { %334 = vmatmul.mubr.f32.gmra.mxu0 %v175_v55  ;;  %419 = vmatmul.mubr.f32.vlgmr.msra.gmra.mxu1 %v173_v56 }
  0x32   : > { %338 = vmatprep.mubr.f32.mxu0 %v180_v57  ;;  %520 = vmatprep.mubr.msk.f32.mxu1 %vm248_vm0, %v178_v58 }
  0x35   : > { %339 = vmatmul.mubr.f32.gmra.mxu0 %v179_v59  ;;  %424 = vmatmul.mubr.f32.gmra.mxu1 %v177_v60 }
  0x36   : > { %343 = vmatprep.mubr.f32.mxu0 %v184_v61  ;;  %521 = vmatprep.mubr.msk.f32.mxu1 %vm248_vm0, %v182_v62 }
  0x39   : > { %344 = vmatmul.mubr.f32.gmra.mxu0 %v183_v63  ;;  %429 = vmatmul.mubr.f32.gmra.mxu1 %v181_v0 }
  0x3a   : > { %348 = vmatprep.mubr.f32.mxu0 %v188_v1  ;;  %522 = vmatprep.mubr.msk.f32.mxu1 %vm248_vm0, %v186_v2 }
  0x3d   : > { %349 = vmatmul.mubr.f32.gmra.mxu0 %v187_v3  ;;  %434 = vmatmul.mubr.f32.gmra.mxu1 %v185_v4 }
  0x3e   : > { %523 = vmatprep.mubr.msk.f32.mxu1 %vm248_vm0, %v190_v5 }
  0x41   : > { %439 = vmatmul.mubr.f32.gmra.mxu1 %v189_v6 }
  0xed   : > { %v558_v7 = vpop.f32.mrf.mxu0 }
  0xef   : > { %v559_v8 = vpop.f32.mrf.mxu0 }
  0xf0   : > { %v560_v10 = vadd.f32 %v559_v8, %v558_v7 }
  0xf1   : > { %v561_v11 = vpop.f32.mrf.mxu0  ;;  %v420_v13 = vpop.f32.mrf.mxu1 }
  0xf2   : > { %v331_v12 = vadd.f32 %v560_v10, %v518_v9 }
  0xf3   : > { %v562_v14 = vpop.f32.mrf.mxu0  ;;  %v422_v17 = vpop.f32.mrf.mxu1 }
  0xf4   : > { %v421_v15 = vadd.f32 %v420_v13, %v331_v12  ;;  %v563_v16 = vadd.f32 %v562_v14, %v561_v11 }
  0xf5   : > { %v564_v18 = vpop.f32.mrf.mxu0  ;;  %v425_v21 = vpop.f32.mrf.mxu1 }
  0xf6   : > { %v444_v19 = vmax.f32 %v421_v15, 0.0  ;;  %v336_v20 = vadd.f32 %v563_v16, %v518_v9 }
  0xf7   : > { %v565_v22 = vpop.f32.mrf.mxu0  ;;  %v427_v25 = vpop.f32.mrf.mxu1 }
  0xf8   : > { %450 = vst.msk [vmem:[%s839_s24] sm:$0xff] %vm449_vm1, %v444_v19  ;;  %v426_v23 = vadd.f32 %v425_v21, %v336_v20  ;;  %v566_v24 = vadd.f32 %v565_v22, %v564_v18 }
  0xf9   : > { %v567_v26 = vpop.f32.mrf.mxu0  ;;  %v430_v29 = vpop.f32.mrf.mxu1 }
  0xfa   : > { %v445_v27 = vmax.f32 %v426_v23, 0.0  ;;  %v341_v28 = vadd.f32 %v566_v24, %v518_v9 }
  0xfb   : > { %v568_v30 = vpop.f32.mrf.mxu0  ;;  %v432_v33 = vpop.f32.mrf.mxu1 }
  0xfc   : > { %451 = vst.msk [vmem:[%s839_s24 + $0x8] sm:$0xff] %vm449_vm1, %v445_v27  ;;  %v431_v31 = vadd.f32 %v430_v29, %v341_v28  ;;  %v569_v32 = vadd.f32 %v568_v30, %v567_v26 }
  0xfd   : > { %v570_v34 = vpop.f32.mrf.mxu0  ;;  %v435_v37 = vpop.f32.mrf.mxu1 }
  0xfe   : > { %v446_v35 = vmax.f32 %v431_v31, 0.0  ;;  %v346_v36 = vadd.f32 %v569_v32, %v518_v9 }
  0xff   : > { %v571_v38 = vpop.f32.mrf.mxu0  ;;  %v437_v41 = vpop.f32.mrf.mxu1 }
 0x100   : > { %452 = vst.msk [vmem:[%s839_s24 + $0x10] sm:$0xff] %vm449_vm1, %v446_v35  ;;  %v436_v39 = vadd.f32 %v435_v37, %v346_v36  ;;  %v572_v40 = vadd.f32 %v571_v38, %v570_v34 }
 0x101   : > { %v440_v44 = vpop.f32.mrf.mxu1 }
 0x102   : > { %v447_v42 = vmax.f32 %v436_v39, 0.0  ;;  %v351_v43 = vadd.f32 %v572_v40, %v518_v9 }
 0x103   : > { %v442_v46 = vpop.f32.mrf.mxu1 }
 0x104   : > { %453 = vst.msk [vmem:[%s839_s24 + $0x18] sm:$0xff] %vm449_vm1, %v447_v42  ;;  %v441_v45 = vadd.f32 %v440_v44, %v351_v43 }
 0x106   : > { %v448_v47 = vmax.f32 %v441_v45, 0.0 }
 0x108   : > { %455 = vst.msk [vmem:[%s839_s24 + $0x20] sm:$0xf] %vm454_vm2, %v448_v47 }
 0x109 PF: > { %s13_s12 = sadd.s32 1, %s590_s12  }
 0x10a   : > { %p10_p4 = scmp.ge.s32.totalorder %s13_s12, 4  }
 0x10c   :  { %12 = sbr.rel (!%p10_p4) target bundleno = 1 (0x1), region = 62 }

// kernel: actor_critic_forward.5
= control target key start
LH: loop header
LB: loop body
LE: loop exit
PB: predicated region body
PF: predicated region fallthrough
CT: control target
= control target key end

     0   :  { %s2300_s0 = inlined_call_operand.vmem [shape: f32[2,1152], index: 0, kind: input, shape index: {}]   ;;  %s2301_s1 = inlined_call_operand.vmem [shape: f32[2,8], index: 1, kind: input, shape index: {}]   ;;  %s2302_s2 = inlined_call_operand.vmem [shape: f32[2,32], index: 2, kind: input, shape index: {}]   ;;  %s2303_s3 = inlined_call_operand.vmem [shape: f32[2,32], index: 3, kind: input, shape index: {}]   ;;  %s2304_s4 = inlined_call_operand.vmem [shape: f32[1152,32], index: 4, kind: input, shape index: {}]   ;;  %s2305_s5 = inlined_call_operand.vmem [shape: f32[8,32], index: 5, kind: input, shape index: {}]   ;;  %s2306_s6 = inlined_call_operand.vmem [shape: f32[1,32], index: 6, kind: input, shape index: {}]   ;;  %s2307_s7 = inlined_call_operand.vmem [shape: f32[32,128], index: 7, kind: input, shape index: {}]   ;;  %s2308_s8 = inlined_call_operand.vmem [shape: f32[32,128], index: 8, kind: input, shape index: {}]   ;;  %s2309_s9 = inlined_call_operand.vmem [shape: f32[1,128], index: 9, kind: input, shape index: {}]   ;;  %s2310_s10 = inlined_call_operand.vmem [shape: f32[32,30], index: 10, kind: input, shape index: {}]   ;;  %s2311_s11 = inlined_call_operand.vmem [shape: f32[1,30], index: 11, kind: input, shape index: {}]   ;;  %s2312_s12 = inlined_call_operand.vmem [shape: f32[32,1], index: 12, kind: input, shape index: {}]   ;;  %s2313_s13 = inlined_call_operand.<no memory space> [shape: f32[1,1], index: 13, kind: input, shape index: {}]   ;;  %s2314_s14 = inlined_call_operand.vmem [shape: f32[2,30], index: 14, kind: output, shape index: {0}]   ;;  %s2315_s15 = inlined_call_operand.vmem [shape: f32[2,1], index: 15, kind: output, shape index: {1}]   ;;  %s2316_s16 = inlined_call_operand.hbm [shape: f32[2,32], index: 16, kind: output, shape index: {2}]   ;;  %s2317_s17 = inlined_call_operand.hbm [shape: f32[2,32], index: 17, kind: output, shape index: {3}]  }
   0x1   :  { %2319 = sst [smem:[#allocation9_spill]] %s2300_s0  ;;  %v23_v0 = vstv %s2313_s13 }
   0x2   :  { %2320 = sst [smem:[#allocation10_spill]] %s2301_s1  ;;  %24 = vst [vmem:[#allocation2] sm:$0x1] %v23_v0 }
   0x3   :  { %25 = vsyncpa [#allocation4], 0  ;;  %v89_v1 = vld [vmem:[%s2304_s4 + $0xf8] sm:$0xff]  ;;  %v203_v2 = vld [vmem:[%s2305_s5] sm:$0xff]  ;;  %v1565_v4 = vmov 0.0   ;;  %s2321_s22 = sld [smem:[#allocation10_spill]]  ;;  %v285_v34 = vlaneseq }
   0x4   :  { %v73_v3 = vld [vmem:[%s2304_s4 + $0x78] sm:$0xff]  ;;  %1390 = vmatprep.subr.mxu0 %v1565_v4  ;;  %1213 = vmatprep.subr.mxu1 %v89_v1  ;;  %v88_v5 = vld [vmem:[%s2304_s4 + $0xf0] sm:$0xff]  ;;  %vm204_vm0 = vcmask 64512   ;;  %vm1566_vm1 = vmmov 0   ;;  %v87_v10 = vld [vmem:[%s2304_s4 + $0xe8] sm:$0xff]  ;;  %s2322_s20 = sld [smem:[#allocation9_spill]] }
   0x5   :  { %v121_v6 = vld [vmem:[%s2304_s4 + $0x1f8] sm:$0xff]  ;;  %1391 = vmatpush3.msra.mxu0 %v203_v2  ;;  %1214 = vmatpush3.msra.mxu1 %v73_v3  ;;  %v72_v8 = vld [vmem:[%s2304_s4 + $0x70] sm:$0xff]  ;;  %v71_v12 = vld [vmem:[%s2304_s4 + $0x68] sm:$0xff]  ;;  %v1567_v32 = vmov 1983009808   ;;  %v286_v44 = vshrl.u32 %v285_v34, 7 }
   0x6   :  { %v105_v9 = vld [vmem:[%s2304_s4 + $0x178] sm:$0xff]  ;;  %1392 = vmatprep.mubr.msk.f32.mxu0 %vm1566_vm1, %v1565_v4  ;;  %1215 = vmatprep.subr.mxu1 %v88_v5  ;;  %v120_v11 = vld [vmem:[%s2304_s4 + $0x1f0] sm:$0xff]  ;;  %v86_v14 = vld [vmem:[%s2304_s4 + $0xe0] sm:$0xff]  ;;  %v283_v33 = vunpack.c.l.s4 %v1567_v32 }
   0x7   :  { %1248 = vmatprep.subr.mxu0 %v121_v6  ;;  %v104_v13 = vld [vmem:[%s2304_s4 + $0x170] sm:$0xff]  ;;  %1216 = vmatpush3.msra.mxu1 %v72_v8  ;;  %v119_v15 = vld [vmem:[%s2304_s4 + $0x1e8] sm:$0xff]  ;;  %v70_v16 = vld [vmem:[%s2304_s4 + $0x60] sm:$0xff] }
   0x8   :  { %1217 = vmatprep.subr.mxu1 %v87_v10  ;;  %v103_v17 = vld [vmem:[%s2304_s4 + $0x168] sm:$0xff]  ;;  %v85_v18 = vld [vmem:[%s2304_s4 + $0xd8] sm:$0xff]  ;;  %v118_v19 = vld [vmem:[%s2304_s4 + $0x1e0] sm:$0xff]  ;;  %v284_v43 = vunpack.c.0.s8 %v283_v33 }
   0x9   :  { %v202_v7 = vld [vmem:[%s2321_s22] sm:$0x3]  ;;  %1218 = vmatpush3.msra.mxu1 %v71_v12  ;;  %v69_v20 = vld [vmem:[%s2304_s4 + $0x58] sm:$0xff]  ;;  %v84_v22 = vld [vmem:[%s2304_s4 + $0xd0] sm:$0xff] }
   0xa   :  { %1393 = vmatmul.mubr.msk.f32.vlgmr.msra.gmra.mxu0 %vm204_vm0, %v202_v7  ;;  %1219 = vmatprep.subr.mxu1 %v86_v14  ;;  %v102_v21 = vld [vmem:[%s2304_s4 + $0x160] sm:$0xff]  ;;  %v117_v23 = vld [vmem:[%s2304_s4 + $0x1d8] sm:$0xff]  ;;  %v68_v24 = vld [vmem:[%s2304_s4 + $0x50] sm:$0xff]  ;;  %v1815_v54 = vsub.s32 %v284_v43, %v286_v44 }
   0xb   :  { %1249 = vmatpush3.msra.mxu0 %v105_v9  ;;  %1220 = vmatpush3.msra.mxu1 %v70_v16  ;;  %v101_v25 = vld [vmem:[%s2304_s4 + $0x158] sm:$0xff]  ;;  %v83_v26 = vld [vmem:[%s2304_s4 + $0xc8] sm:$0xff]  ;;  %v116_v27 = vld [vmem:[%s2304_s4 + $0x1d0] sm:$0xff] }
   0xc   :  { %1250 = vmatprep.subr.mxu0 %v120_v11  ;;  %1221 = vmatprep.subr.mxu1 %v85_v18  ;;  %v67_v28 = vld [vmem:[%s2304_s4 + $0x48] sm:$0xff]  ;;  %v100_v29 = vld [vmem:[%s2304_s4 + $0x150] sm:$0xff]  ;;  %v82_v30 = vld [vmem:[%s2304_s4 + $0xc0] sm:$0xff] }
   0xd   :  { %1251 = vmatpush3.msra.mxu0 %v104_v13  ;;  %1222 = vmatpush3.msra.mxu1 %v69_v20  ;;  %v115_v31 = vld [vmem:[%s2304_s4 + $0x1c8] sm:$0xff]  ;;  %v66_v35 = vld [vmem:[%s2304_s4 + $0x40] sm:$0xff]  ;;  %v81_v37 = vld [vmem:[%s2304_s4 + $0xb8] sm:$0xff] }
   0xe   :  { %1252 = vmatprep.subr.mxu0 %v119_v15  ;;  %1223 = vmatprep.subr.mxu1 %v84_v22  ;;  %v99_v36 = vld [vmem:[%s2304_s4 + $0x148] sm:$0xff]  ;;  %v114_v38 = vld [vmem:[%s2304_s4 + $0x1c0] sm:$0xff]  ;;  %v65_v39 = vld [vmem:[%s2304_s4 + $0x38] sm:$0xff] }
   0xf   :  { %1253 = vmatpush3.msra.mxu0 %v103_v17  ;;  %1224 = vmatpush3.msra.mxu1 %v68_v24  ;;  %v98_v40 = vld [vmem:[%s2304_s4 + $0x140] sm:$0xff]  ;;  %v80_v41 = vld [vmem:[%s2304_s4 + $0xb0] sm:$0xff]  ;;  %v113_v42 = vld [vmem:[%s2304_s4 + $0x1b8] sm:$0xff] }
  0x10   :  { %1254 = vmatprep.subr.mxu0 %v118_v19  ;;  %1225 = vmatprep.subr.mxu1 %v83_v26  ;;  %v64_v45 = vld [vmem:[%s2304_s4 + $0x30] sm:$0xff]  ;;  %v97_v46 = vld [vmem:[%s2304_s4 + $0x138] sm:$0xff]  ;;  %v79_v47 = vld [vmem:[%s2304_s4 + $0xa8] sm:$0xff] }
  0x11   :  { %1255 = vmatpush3.msra.mxu0 %v102_v21  ;;  %1226 = vmatpush3.msra.mxu1 %v67_v28  ;;  %v112_v48 = vld [vmem:[%s2304_s4 + $0x1b0] sm:$0xff]  ;;  %v63_v49 = vld [vmem:[%s2304_s4 + $0x28] sm:$0xff]  ;;  %v78_v51 = vld [vmem:[%s2304_s4 + $0xa0] sm:$0xff] }
  0x12   :  { %1256 = vmatprep.subr.mxu0 %v117_v23  ;;  %1227 = vmatprep.subr.mxu1 %v82_v30  ;;  %v96_v50 = vld [vmem:[%s2304_s4 + $0x130] sm:$0xff]  ;;  %v111_v52 = vld [vmem:[%s2304_s4 + $0x1a8] sm:$0xff]  ;;  %v55_v53 = vld [vmem:[%s2322_s20] sm:$0xff] }
  0x13   :  { %1257 = vmatpush3.msra.mxu0 %v101_v25  ;;  %1228 = vmatpush3.msra.mxu1 %v66_v35  ;;  %v62_v55 = vld [vmem:[%s2304_s4 + $0x20] sm:$0xff]  ;;  %v95_v56 = vld [vmem:[%s2304_s4 + $0x128] sm:$0xff]  ;;  %v77_v57 = vld [vmem:[%s2304_s4 + $0x98] sm:$0xff]  ;;  %v281_v61 = vcombine.high %v55_v53, %v55_v53  ;;  %v288_v0 = vrot.slane %v55_v53, %v1815_v54 }
  0x14   :  { %1258 = vmatprep.subr.mxu0 %v116_v27  ;;  %1229 = vmatprep.subr.mxu1 %v81_v37  ;;  %v110_v58 = vld [vmem:[%s2304_s4 + $0x1a0] sm:$0xff]  ;;  %v61_v59 = vld [vmem:[%s2304_s4 + $0x18] sm:$0xff]  ;;  %v76_v62 = vld [vmem:[%s2304_s4 + $0x90] sm:$0xff] }
  0x15   :  { %1259 = vmatpush3.msra.mxu0 %v100_v29  ;;  %1230 = vmatpush3.msra.mxu1 %v65_v39  ;;  %v94_v60 = vld [vmem:[%s2304_s4 + $0x120] sm:$0xff]  ;;  %v109_v63 = vld [vmem:[%s2304_s4 + $0x198] sm:$0xff]  ;;  %v60_v1 = vld [vmem:[%s2304_s4 + $0x10] sm:$0xff]  ;;  %v295_v8 = vrot.slane %v281_v61, %v1815_v54  ;;  %v296_v11 = vcombine.high %v288_v0, %v288_v0 }
  0x16   :  { %1260 = vmatprep.subr.mxu0 %v115_v31  ;;  %1231 = vmatprep.subr.mxu1 %v80_v41  ;;  %v93_v2 = vld [vmem:[%s2304_s4 + $0x118] sm:$0xff]  ;;  %v75_v3 = vld [vmem:[%s2304_s4 + $0x88] sm:$0xff]  ;;  %v108_v5 = vld [vmem:[%s2304_s4 + $0x190] sm:$0xff] }
  0x17   :  { %1261 = vmatpush3.msra.mxu0 %v99_v36  ;;  %1232 = vmatpush3.msra.mxu1 %v64_v45  ;;  %v59_v6 = vld [vmem:[%s2304_s4 + $0x8] sm:$0xff]  ;;  %v92_v7 = vld [vmem:[%s2304_s4 + $0x110] sm:$0xff]  ;;  %v74_v9 = vld [vmem:[%s2304_s4 + $0x80] sm:$0xff]  ;;  %v297_v16 = vcombine.high %v295_v8, %v295_v8 }
  0x18   :  { %1262 = vmatprep.subr.mxu0 %v114_v38  ;;  %1233 = vmatprep.subr.mxu1 %v79_v47  ;;  %v107_v10 = vld [vmem:[%s2304_s4 + $0x188] sm:$0xff]  ;;  %v58_v12 = vld [vmem:[%s2304_s4] sm:$0xff]  ;;  %v153_v15 = vld [vmem:[%s2304_s4 + $0x2f8] sm:$0xff] }
  0x19   :  { %1263 = vmatpush3.msra.mxu0 %v98_v40  ;;  %1234 = vmatpush3.msra.mxu1 %v63_v49  ;;  %v91_v13 = vld [vmem:[%s2304_s4 + $0x108] sm:$0xff]  ;;  %v106_v14 = vld [vmem:[%s2304_s4 + $0x180] sm:$0xff]  ;;  %v137_v18 = vld [vmem:[%s2304_s4 + $0x278] sm:$0xff] }
  0x1a   :  { %1264 = vmatprep.subr.mxu0 %v113_v42  ;;  %1235 = vmatprep.subr.mxu1 %v78_v51  ;;  %v90_v17 = vld [vmem:[%s2304_s4 + $0x100] sm:$0xff]  ;;  %v152_v19 = vld [vmem:[%s2304_s4 + $0x2f0] sm:$0xff]  ;;  %v185_v20 = vld [vmem:[%s2304_s4 + $0x3f8] sm:$0xff] }
  0x1b   :  { %1265 = vmatpush3.msra.mxu0 %v97_v46  ;;  %1236 = vmatpush3.msra.mxu1 %v62_v55  ;;  %v136_v21 = vld [vmem:[%s2304_s4 + $0x270] sm:$0xff]  ;;  %v169_v22 = vld [vmem:[%s2304_s4 + $0x378] sm:$0xff]  ;;  %v151_v23 = vld [vmem:[%s2304_s4 + $0x2e8] sm:$0xff] }
  0x1c   :  { %1266 = vmatprep.subr.mxu0 %v112_v48  ;;  %1237 = vmatprep.subr.mxu1 %v77_v57  ;;  %v184_v24 = vld [vmem:[%s2304_s4 + $0x3f0] sm:$0xff]  ;;  %v135_v25 = vld [vmem:[%s2304_s4 + $0x268] sm:$0xff]  ;;  %v150_v27 = vld [vmem:[%s2304_s4 + $0x2e0] sm:$0xff] }
  0x1d   :  { %1267 = vmatpush3.msra.mxu0 %v96_v50  ;;  %1238 = vmatpush3.msra.mxu1 %v61_v59  ;;  %v168_v26 = vld [vmem:[%s2304_s4 + $0x370] sm:$0xff]  ;;  %v183_v28 = vld [vmem:[%s2304_s4 + $0x3e8] sm:$0xff]  ;;  %v134_v29 = vld [vmem:[%s2304_s4 + $0x260] sm:$0xff] }
  0x1e   :  { %1268 = vmatprep.subr.mxu0 %v111_v52  ;;  %1239 = vmatprep.subr.mxu1 %v76_v62  ;;  %v167_v30 = vld [vmem:[%s2304_s4 + $0x368] sm:$0xff]  ;;  %v149_v31 = vld [vmem:[%s2304_s4 + $0x2d8] sm:$0xff]  ;;  %v182_v32 = vld [vmem:[%s2304_s4 + $0x3e0] sm:$0xff] }
  0x1f   :  { %1269 = vmatpush3.msra.mxu0 %v95_v56  ;;  %1240 = vmatpush3.msra.mxu1 %v60_v1  ;;  %v133_v33 = vld [vmem:[%s2304_s4 + $0x258] sm:$0xff]  ;;  %v166_v34 = vld [vmem:[%s2304_s4 + $0x360] sm:$0xff]  ;;  %v148_v35 = vld [vmem:[%s2304_s4 + $0x2d0] sm:$0xff] }
  0x20   :  { %1270 = vmatprep.subr.mxu0 %v110_v58  ;;  %1241 = vmatprep.subr.mxu1 %v75_v3  ;;  %v181_v36 = vld [vmem:[%s2304_s4 + $0x3d8] sm:$0xff]  ;;  %v132_v37 = vld [vmem:[%s2304_s4 + $0x250] sm:$0xff]  ;;  %v147_v39 = vld [vmem:[%s2304_s4 + $0x2c8] sm:$0xff] }
  0x21   :  { %1271 = vmatpush3.msra.mxu0 %v94_v60  ;;  %1242 = vmatpush3.msra.mxu1 %v59_v6  ;;  %v165_v38 = vld [vmem:[%s2304_s4 + $0x358] sm:$0xff]  ;;  %v180_v40 = vld [vmem:[%s2304_s4 + $0x3d0] sm:$0xff]  ;;  %v131_v41 = vld [vmem:[%s2304_s4 + $0x248] sm:$0xff] }
  0x22   :  { %1272 = vmatprep.subr.mxu0 %v109_v63  ;;  %1243 = vmatprep.subr.mxu1 %v74_v9  ;;  %v164_v42 = vld [vmem:[%s2304_s4 + $0x350] sm:$0xff]  ;;  %v146_v43 = vld [vmem:[%s2304_s4 + $0x2c0] sm:$0xff]  ;;  %v179_v44 = vld [vmem:[%s2304_s4 + $0x3c8] sm:$0xff] }
  0x23   :  { %1273 = vmatpush3.msra.mxu0 %v93_v2  ;;  %1244 = vmatpush3.msra.mxu1 %v58_v12  ;;  %v130_v45 = vld [vmem:[%s2304_s4 + $0x240] sm:$0xff]  ;;  %v163_v46 = vld [vmem:[%s2304_s4 + $0x348] sm:$0xff]  ;;  %v145_v47 = vld [vmem:[%s2304_s4 + $0x2b8] sm:$0xff] }
  0x24   :  { %1274 = vmatprep.subr.mxu0 %v108_v5  ;;  %395 = vmatprep.mubr.f32.mxu1 %v296_v11  ;;  %v178_v48 = vld [vmem:[%s2304_s4 + $0x3c0] sm:$0xff]  ;;  %v129_v49 = vld [vmem:[%s2304_s4 + $0x238] sm:$0xff] }
  0x25   :  { %1275 = vmatpush3.msra.mxu0 %v92_v7  ;;  %396 = vmatmul.mubr.f32.vlgmr.msra.gmra.mxu1 %v288_v0  ;;  %v162_v50 = vld [vmem:[%s2304_s4 + $0x340] sm:$0xff] }
  0x26   :  { %1276 = vmatprep.subr.mxu0 %v107_v10  ;;  %1283 = vmatprep.subr.mxu1 %v153_v15 }
  0x27   :  { %1277 = vmatpush3.msra.mxu0 %v91_v13  ;;  %465 = vmatprep.mubr.f32.mxu0 %v297_v16 }
  0x28   :  { %1278 = vmatprep.subr.mxu0 %v106_v14  ;;  %1284 = vmatpush3.msra.mxu1 %v137_v18 }
  0x29   :  { %1279 = vmatpush3.msra.mxu0 %v90_v17  ;;  %1285 = vmatprep.subr.mxu1 %v152_v19 }
  0x2a   :  { %466 = vmatmul.mubr.f32.vlgmr.msra.gmra.mxu0 %v295_v8  ;;  %1318 = vmatprep.subr.mxu0 %v185_v20 }
  0x2b   :  { %1286 = vmatpush3.msra.mxu1 %v136_v21  ;;  %1319 = vmatpush3.msra.mxu0 %v169_v22 }
  0x2c   :  { %1287 = vmatprep.subr.mxu1 %v151_v23  ;;  %1320 = vmatprep.subr.mxu0 %v184_v24 }
  0x2d   :  { %1288 = vmatpush3.msra.mxu1 %v135_v25  ;;  %1321 = vmatpush3.msra.mxu0 %v168_v26 }
  0x2e   :  { %1289 = vmatprep.subr.mxu1 %v150_v27  ;;  %1322 = vmatprep.subr.mxu0 %v183_v28 }
  0x2f   :  { %1290 = vmatpush3.msra.mxu1 %v134_v29  ;;  %1323 = vmatpush3.msra.mxu0 %v167_v30 }
  0x30   :  { %1291 = vmatprep.subr.mxu1 %v149_v31  ;;  %1324 = vmatprep.subr.mxu0 %v182_v32 }
  0x31   :  { %1292 = vmatpush3.msra.mxu1 %v133_v33  ;;  %1325 = vmatpush3.msra.mxu0 %v166_v34 }
  0x32   :  { %1293 = vmatprep.subr.mxu1 %v148_v35  ;;  %1326 = vmatprep.subr.mxu0 %v181_v36 }
  0x33   :  { %1294 = vmatpush3.msra.mxu1 %v132_v37  ;;  %1327 = vmatpush3.msra.mxu0 %v165_v38 }
  0x34   :  { %1295 = vmatprep.subr.mxu1 %v147_v39  ;;  %1328 = vmatprep.subr.mxu0 %v180_v40 }
  0x35   :  { %1296 = vmatpush3.msra.mxu1 %v131_v41  ;;  %1329 = vmatpush3.msra.mxu0 %v164_v42 }
  0x36   :  { %1297 = vmatprep.subr.mxu1 %v146_v43  ;;  %1330 = vmatprep.subr.mxu0 %v179_v44 }
  0x37   :  { %26 = vsyncpa [#allocation6], 0  ;;  %1298 = vmatpush3.msra.mxu1 %v130_v45  ;;  %1331 = vmatpush3.msra.mxu0 %v163_v46  ;;  %v144_v51 = vld [vmem:[%s2304_s4 + $0x2b0] sm:$0xff]  ;;  %v177_v52 = vld [vmem:[%s2304_s4 + $0x3b8] sm:$0xff]  ;;  %vm698_vm2 = vcmask 261120   ;;  %s1569_s1 = smov 32  }
  0x38   :  { %1299 = vmatprep.subr.mxu1 %v145_v47  ;;  %1332 = vmatprep.subr.mxu0 %v178_v48  ;;  %v128_v53 = vld [vmem:[%s2304_s4 + $0x230] sm:$0xff]  ;;  %v161_v55 = vld [vmem:[%s2304_s4 + $0x338] sm:$0xff]  ;;  %v143_v56 = vld [vmem:[%s2304_s4 + $0x2a8] sm:$0xff]  ;;  %vm886_vm3 = vcmask 254976   ;;  %vm1004_vm4 = vcmask 115792   ;;  %vm988_vm5 = vcmask 74792  }
  0x39   :  { %1300 = vmatpush3.msra.mxu1 %v129_v49  ;;  %1333 = vmatpush3.msra.mxu0 %v162_v50  ;;  %v176_v57 = vld [vmem:[%s2304_s4 + $0x3b0] sm:$0xff]  ;;  %v127_v58 = vld [vmem:[%s2304_s4 + $0x228] sm:$0xff]  ;;  %v142_v60 = vld [vmem:[%s2304_s4 + $0x2a0] sm:$0xff]  ;;  %vm1020_vm6 = vcmask 156792   ;;  %vm1036_vm7 = vcmask 197792   ;;  %vm1162_vm8 = vcmask 1024  }
  0x3a   :  { %1301 = vmatprep.subr.mxu1 %v144_v51  ;;  %1334 = vmatprep.subr.mxu0 %v177_v52  ;;  %v160_v59 = vld [vmem:[%s2304_s4 + $0x330] sm:$0xff]  ;;  %v175_v61 = vld [vmem:[%s2304_s4 + $0x3a8] sm:$0xff]  ;;  %v126_v63 = vld [vmem:[%s2304_s4 + $0x220] sm:$0xff]  ;;  %vm1052_vm9 = vcmask 238792   ;;  %vm976_vm10 = vcmask 33792   ;;  %s1571_s0 = smov 123  }
  0x3b   :  { %1302 = vmatpush3.msra.mxu1 %v128_v53  ;;  %1335 = vmatpush3.msra.mxu0 %v161_v55  ;;  %v56_v62 = vld [vmem:[%s2322_s20 + $0x8] sm:$0xff]  ;;  %v141_v1 = vld [vmem:[%s2304_s4 + $0x298] sm:$0xff]  ;;  %v174_v2 = vld [vmem:[%s2304_s4 + $0x3a0] sm:$0xff]  ;;  %s1572_s30 = smov 113   ;;  %s1573_s18 = smov 108  }
  0x3c   :  { %1303 = vmatprep.subr.mxu1 %v143_v56  ;;  %1336 = vmatprep.subr.mxu0 %v176_v57  ;;  %v159_v0 = vld [vmem:[%s2304_s4 + $0x328] sm:$0xff]  ;;  %v125_v3 = vld [vmem:[%s2304_s4 + $0x218] sm:$0xff]  ;;  %v158_v5 = vld [vmem:[%s2304_s4 + $0x320] sm:$0xff]  ;;  %v298_v6 = vcombine.high %v56_v62, %v56_v62  ;;  %v305_v9 = vrot.slane %v56_v62, %v1815_v54  ;;  %s1575_s13 = smov 96   ;;  %s1576_s19 = smov [#allocation3]  }
  0x3d   :  { %1304 = vmatpush3.msra.mxu1 %v127_v58  ;;  %1337 = vmatpush3.msra.mxu0 %v160_v59  ;;  %v140_v7 = vld [vmem:[%s2304_s4 + $0x290] sm:$0xff]  ;;  %v173_v8 = vld [vmem:[%s2304_s4 + $0x398] sm:$0xff]  ;;  %v139_v12 = vld [vmem:[%s2304_s4 + $0x288] sm:$0xff] }
  0x3e   :  { %1305 = vmatprep.subr.mxu1 %v142_v60  ;;  %1338 = vmatprep.subr.mxu0 %v175_v61  ;;  %v124_v10 = vld [vmem:[%s2304_s4 + $0x210] sm:$0xff]  ;;  %v157_v11 = vld [vmem:[%s2304_s4 + $0x318] sm:$0xff]  ;;  %v123_v14 = vld [vmem:[%s2304_s4 + $0x208] sm:$0xff]  ;;  %v312_v16 = vrot.slane %v298_v6, %v1815_v54  ;;  %v313_v19 = vcombine.high %v305_v9, %v305_v9 }
  0x3f   :  { %1306 = vmatpush3.msra.mxu1 %v126_v63  ;;  %1339 = vmatpush3.msra.mxu0 %v159_v0  ;;  %v172_v13 = vld [vmem:[%s2304_s4 + $0x390] sm:$0xff]  ;;  %v138_v17 = vld [vmem:[%s2304_s4 + $0x280] sm:$0xff]  ;;  %v171_v18 = vld [vmem:[%s2304_s4 + $0x388] sm:$0xff] }
  0x40   :  { %1307 = vmatprep.subr.mxu1 %v141_v1  ;;  %1340 = vmatprep.subr.mxu0 %v174_v2  ;;  %v156_v15 = vld [vmem:[%s2304_s4 + $0x310] sm:$0xff]  ;;  %v122_v20 = vld [vmem:[%s2304_s4 + $0x200] sm:$0xff]  ;;  %v155_v54 = vld [vmem:[%s2304_s4 + $0x308] sm:$0xff]  ;;  %v314_v22 = vcombine.high %v312_v16, %v312_v16 }
  0x41   :  { %1308 = vmatpush3.msra.mxu1 %v125_v3  ;;  %1341 = vmatpush3.msra.mxu0 %v158_v5  ;;  %v170_v21 = vld [vmem:[%s2304_s4 + $0x380] sm:$0xff]  ;;  %v201_v24 = vld [vmem:[%s2304_s4 + $0x478] sm:$0xff]  ;;  %v200_v25 = vld [vmem:[%s2304_s4 + $0x470] sm:$0xff] }
  0x42   :  { %1309 = vmatprep.subr.mxu1 %v140_v7  ;;  %1342 = vmatprep.subr.mxu0 %v173_v8  ;;  %v154_v23 = vld [vmem:[%s2304_s4 + $0x300] sm:$0xff]  ;;  %v199_v26 = vld [vmem:[%s2304_s4 + $0x468] sm:$0xff]  ;;  %v197_v28 = vld [vmem:[%s2304_s4 + $0x458] sm:$0xff] }
  0x43   :  { %1310 = vmatpush3.msra.mxu1 %v124_v10  ;;  %1343 = vmatpush3.msra.mxu0 %v157_v11  ;;  %v198_v27 = vld [vmem:[%s2304_s4 + $0x460] sm:$0xff]  ;;  %v196_v29 = vld [vmem:[%s2304_s4 + $0x450] sm:$0xff]  ;;  %v195_v30 = vld [vmem:[%s2304_s4 + $0x448] sm:$0xff] }
  0x44   :  { %1311 = vmatprep.subr.mxu1 %v139_v12  ;;  %1344 = vmatprep.subr.mxu0 %v172_v13  ;;  %v194_v31 = vld [vmem:[%s2304_s4 + $0x440] sm:$0xff]  ;;  %v193_v32 = vld [vmem:[%s2304_s4 + $0x438] sm:$0xff]  ;;  %v192_v33 = vld [vmem:[%s2304_s4 + $0x430] sm:$0xff] }
  0x45   :  { %1312 = vmatpush3.msra.mxu1 %v123_v14  ;;  %1345 = vmatpush3.msra.mxu0 %v156_v15  ;;  %v191_v34 = vld [vmem:[%s2304_s4 + $0x428] sm:$0xff]  ;;  %v190_v35 = vld [vmem:[%s2304_s4 + $0x420] sm:$0xff]  ;;  %v189_v36 = vld [vmem:[%s2304_s4 + $0x418] sm:$0xff] }
  0x46   :  { %1313 = vmatprep.subr.mxu1 %v138_v17  ;;  %1346 = vmatprep.subr.mxu0 %v171_v18  ;;  %v188_v37 = vld [vmem:[%s2304_s4 + $0x410] sm:$0xff]  ;;  %v187_v38 = vld [vmem:[%s2304_s4 + $0x408] sm:$0xff]  ;;  %v186_v39 = vld [vmem:[%s2304_s4 + $0x400] sm:$0xff] }
  0x47   :  { %1314 = vmatpush3.msra.mxu1 %v122_v20  ;;  %535 = vmatprep.mubr.f32.mxu1 %v313_v19  ;;  %v1201_v40 = vld.sshfl [vmem:[%s2322_s20 + $0x10] sm:$0x3 pattern:$0x76325410]  ;;  %v697_v41 = vld [vmem:[%s2308_s8 + $0x18] sm:$0xff]  ;;  %v695_v43 = vld [vmem:[%s2308_s8 + $0x8] sm:$0xff] }
  0x48   :  { %1347 = vmatpush3.msra.mxu0 %v155_v54  ;;  %536 = vmatmul.mubr.f32.vlgmr.msra.gmra.mxu1 %v305_v9  ;;  %v696_v42 = vld [vmem:[%s2308_s8 + $0x10] sm:$0xff]  ;;  %v694_v44 = vld [vmem:[%s2308_s8] sm:$0xff]  ;;  %v692_v46 = vld [vmem:[%s2307_s7 + $0x18] sm:$0xff] }
  0x49   :  { %1348 = vmatprep.subr.mxu0 %v170_v21  ;;  %1395 = vmatprep.subr.mxu1 %v1565_v4  ;;  %v693_v45 = vld [vmem:[%s2302_s2] sm:$0x3]  ;;  %v691_v47 = vld [vmem:[%s2307_s7 + $0x10] sm:$0xff]  ;;  %v690_v48 = vld [vmem:[%s2307_s7 + $0x8] sm:$0xff] }
  0x4a   :  { %1349 = vmatpush3.msra.mxu0 %v154_v23  ;;  %605 = vmatprep.mubr.f32.mxu0 %v314_v22  ;;  %v689_v49 = vld [vmem:[%s2307_s7] sm:$0xff] }
  0x4b   :  { %1396 = vmatpush3.msra.mxu1 %v201_v24  ;;  %606 = vmatmul.mubr.f32.vlgmr.msra.gmra.mxu0 %v312_v16  ;;  %v1202_v7 = vld [vmem:[%s2306_s6] ss:$0 sm:$0xff]  ;;  %s1568_s6 = smov 64  }
  0x4c   :  { %1397 = vmatprep.subr.mxu1 %v1565_v4  ;;  %1427 = vmatprep.mubr.msk.f32.mxu1 %vm1566_vm1, %v1565_v4  ;;  %v1205_v14 = vld [vmem:[%s2309_s9] ss:$0 sm:$0xff] }
  0x4d   :  { %1398 = vmatpush3.msra.mxu1 %v200_v25  ;;  %1430 = vmatprep.subr.mxu0 %v1565_v4  ;;  %v860_v19 = vld [vmem:[%s2303_s3] sm:$0x3]  ;;  %s1577_s3 = smov [#allocation5]  }
  0x4e   :  { %1399 = vmatprep.subr.mxu1 %v1565_v4  ;;  %1438 = vmatprep.mubr.msk.f32.mxu0 %vm1566_vm1, %v1565_v4  ;;  %s1184_s9 = sshll.u32 %s1577_s3, 4  ;;  %s1185_s9 = int_to_ptr.vmem [resolvable:$true] %s1184_s9 }
  0x4f   :  { %1400 = vmatpush3.msra.mxu1 %v199_v26  ;;  %1431 = vmatpush3.msra.mxu0 %v697_v41  ;;  %v1207_v41 = vld [vmem:[%s2311_s11] ss:$0 sm:$0xff] }
  0x50   :  { %1401 = vmatprep.subr.mxu1 %v1565_v4  ;;  %1432 = vmatprep.subr.mxu0 %v1565_v4 }
  0x51   :  { %1402 = vmatpush3.msra.mxu1 %v198_v27  ;;  %1433 = vmatpush3.msra.mxu0 %v696_v42 }
  0x52   :  { %1403 = vmatprep.subr.mxu1 %v1565_v4  ;;  %1434 = vmatprep.subr.mxu0 %v1565_v4 }
  0x53   :  { %1404 = vmatpush3.msra.mxu1 %v197_v28  ;;  %1435 = vmatpush3.msra.mxu0 %v695_v43 }
  0x54   :  { %1405 = vmatprep.subr.mxu1 %v1565_v4  ;;  %1436 = vmatprep.subr.mxu0 %v1565_v4 }
  0x55   :  { %1406 = vmatpush3.msra.mxu1 %v196_v29  ;;  %1437 = vmatpush3.msra.mxu0 %v694_v44  ;;  %v896_v29 = vld [vmem:[%s2310_s10 + $0x18] sm:$0xff] }
  0x56   :  { %1407 = vmatprep.subr.mxu1 %v1565_v4  ;;  %1439 = vmatmul.mubr.msk.f32.vlgmr.msra.gmra.mxu0 %vm698_vm2, %v693_v45 }
  0x57   :  { %1408 = vmatpush3.msra.mxu1 %v195_v30  ;;  %1441 = vmatprep.subr.mxu0 %v1565_v4  ;;  %v895_v30 = vld [vmem:[%s2310_s10 + $0x10] sm:$0xff] }
  0x58   :  { %1409 = vmatprep.subr.mxu1 %v1565_v4  ;;  %1442 = vmatpush3.msra.mxu0 %v692_v46 }
  0x59   :  { %1410 = vmatpush3.msra.mxu1 %v194_v31  ;;  %1449 = vmatprep.mubr.msk.f32.mxu0 %vm1566_vm1, %v1565_v4  ;;  %v894_v31 = vld [vmem:[%s2310_s10 + $0x8] sm:$0xff] }
  0x5a   :  { %1411 = vmatprep.subr.mxu1 %v1565_v4  ;;  %1443 = vmatprep.subr.mxu0 %v1565_v4 }
  0x5b   :  { %1412 = vmatpush3.msra.mxu1 %v193_v32  ;;  %1444 = vmatpush3.msra.mxu0 %v691_v47  ;;  %v893_v32 = vld [vmem:[%s2310_s10] sm:$0xff] }
  0x5c   :  { %1413 = vmatprep.subr.mxu1 %v1565_v4  ;;  %1445 = vmatprep.subr.mxu0 %v1565_v4 }
  0x5d   :  { %1414 = vmatpush3.msra.mxu1 %v192_v33  ;;  %1446 = vmatpush3.msra.mxu0 %v690_v48 }
  0x5e   :  { %1415 = vmatprep.subr.mxu1 %v1565_v4  ;;  %1447 = vmatprep.subr.mxu0 %v1565_v4 }
  0x5f   :  { %1416 = vmatpush3.msra.mxu1 %v191_v34  ;;  %1448 = vmatpush3.msra.mxu0 %v689_v49 }
  0x60   :  { %1417 = vmatprep.subr.mxu1 %v1565_v4  ;;  %1452 = vmatprep.subr.mxu0 %v1565_v4 }
  0x61   :  { %1418 = vmatpush3.msra.mxu1 %v190_v35 }
  0x62   :  { %1419 = vmatprep.subr.mxu1 %v1565_v4 }
  0x63   :  { %1420 = vmatpush3.msra.mxu1 %v189_v36  ;;  %v1084_v36 = vld [vmem:[%s2312_s12 + $0x18] sm:$0xff] }
  0x64   :  { %1421 = vmatprep.subr.mxu1 %v1565_v4 }
  0x65   :  { %1422 = vmatpush3.msra.mxu1 %v188_v37 }
  0x66   :  { %1423 = vmatprep.subr.mxu1 %v1565_v4 }
  0x67   :  { %1424 = vmatpush3.msra.mxu1 %v187_v38  ;;  %v1083_v38 = vld [vmem:[%s2312_s12 + $0x10] sm:$0xff] }
  0x68   :  { %1425 = vmatprep.subr.mxu1 %v1565_v4 }
  0x69   :  { %1426 = vmatpush3.msra.mxu1 %v186_v39  ;;  %v1082_v39 = vld [vmem:[%s2312_s12 + $0x8] sm:$0xff] }
  0x6a   :  { %1428 = vmatmul.mubr.f32.vlgmr.msra.gmra.mxu1 %v1201_v40  ;;  %v1081_v40 = vld [vmem:[%s2312_s12] sm:$0xff] }
  0xca   :  { %v274_v50 = vpop.f32.mrf.mxu0 }
  0xcc   :  { %v1394_v51 = vpop.f32.mrf.mxu0 }
  0xe5   :  { %v1245_v52 = vpop.f32.mrf.mxu1 }
  0xe7   :  { %v1246_v53 = vpop.f32.mrf.mxu1 }
  0xe8   :  { %v1247_v57 = vadd.f32 %v1246_v53, %v1245_v52 }
  0xea   :  { %v1280_v55 = vpop.f32.mrf.mxu0  ;;  %v398_v61 = vadd.f32 %v1247_v57, %v274_v50 }
  0xec   :  { %v1281_v58 = vpop.f32.mrf.mxu0 }
  0xed   :  { %v1282_v62 = vadd.f32 %v1281_v58, %v1280_v55 }
  0xef   :  { %v468_v1 = vadd.f32 %v1282_v62, %v398_v61 }
 0x108   :  { %v1315_v56 = vpop.f32.mrf.mxu1 }
 0x10a   :  { %v1316_v59 = vpop.f32.mrf.mxu1 }
 0x10b   :  { %v1350_v60 = vpop.f32.mrf.mxu0  ;;  %v1317_v63 = vadd.f32 %v1316_v59, %v1315_v56 }
 0x10d   :  { %v1351_v0 = vpop.f32.mrf.mxu0  ;;  %v538_v2 = vadd.f32 %v1317_v63, %v468_v1 }
 0x10e   :  { %v1352_v3 = vadd.f32 %v1351_v0, %v1350_v60 }
 0x110   :  { %v608_v5 = vadd.f32 %v1352_v3, %v538_v2 }
 0x116   :  { %v768_v11 = vpop.f32.mrf.mxu0 }
 0x118   :  { %v1440_v12 = vpop.f32.mrf.mxu0 }
 0x12a   :  { %v677_v6 = vpop.f32.mrf.mxu1 }
 0x12b   :  { %v678_v8 = vadd.f32 %v677_v6, %v608_v5 }
 0x12c   :  { %v1429_v9 = vpop.f32.mrf.mxu1 }
 0x12d   :  { %v688_v10 = vadd.f32 %v1202_v7, %v678_v8 }
 0x12f   :  { %1450 = vmatmul.mubr.msk.f32.vlgmr.msra.gmra.mxu0 %vm698_vm2, %v688_v10 }
 0x130   :  { %1460 = vmatprep.mubr.msk.f32.mxu0 %vm1566_vm1, %v1565_v4  ;;  %1453 = vmatpush3.msra.mxu0 %v896_v29 }
 0x131   :  { %1454 = vmatprep.subr.mxu0 %v1565_v4 }
 0x132   :  { %1455 = vmatpush3.msra.mxu0 %v895_v30 }
 0x133   :  { %1456 = vmatprep.subr.mxu0 %v1565_v4 }
 0x134   :  { %1457 = vmatpush3.msra.mxu0 %v894_v31 }
 0x135   :  { %1458 = vmatprep.subr.mxu0 %v1565_v4 }
 0x136   :  { %1459 = vmatpush3.msra.mxu0 %v893_v32 }
 0x137   :  { %1463 = vmatprep.subr.mxu0 %v1565_v4 }
 0x1ef   :  { %v841_v13 = vpop.f32.mrf.mxu0 }
 0x1f0   :  { %v842_v15 = vadd.f32 %v841_v13, %v768_v11 }
 0x1f1   :  { %v1451_v16 = vpop.f32.mrf.mxu0 }
 0x1f2   :  { %v852_v17 = vadd.f32 %v1205_v14, %v842_v15 }
 0x1f4   :  { %1489 = vtanh.f32 %v852_v17  ;;  %v1206_v20 = vmul.f32 -1.442695, %v852_v17 }
 0x1f6   :  { %1491 = vpow2.f32 %v1206_v20 }
 0x201   :  { %v1490_v18 = vpop.eup %1489 }
 0x202   :  { %867 = vrot.lane.b32.xlu0 %v1490_v18, %s1568_s6 }
 0x203   :  { %v1492_v54 = vpop.eup %1491 }
 0x204   :  { %v856_v21 = vadd.f32 1.0, %v1492_v54 }
 0x206   :  { %862 = vrot.lane.b32.xlu0 %v860_v19, %s1569_s1  ;;  %1493 = vrcp.f32 %v856_v21 }
 0x213   :  { %v1494_v22 = vpop.eup %1493 }
 0x274   :  { %v868_v23 = vpop.permute.xlu0 %867 }
 0x275   :  { %v870_v24 = vmul.f32 %v1494_v22, %v868_v23 }
 0x277   :  { %872 = vrot.lane.b32.xlu1 %v870_v24, %s1569_s1 }
 0x278   :  { %v863_v25 = vpop.permute.xlu0 %862 }
 0x279   :  { %v865_v26 = vmul.f32 %v1494_v22, %v863_v25 }
 0x2e9   :  { %v873_v27 = vpop.permute.xlu1 %872 }
 0x2ea   :  { %v2201_v28 = vadd.f32 %v873_v27, %v865_v26 }
 0x2ec   :  { %1495 = vtanh.f32 %v2201_v28 }
 0x2f9   :  { %v1496_v33 = vpop.eup %1495 }
 0x2fa   :  { %878 = vrot.lane.b32.xlu1 %v1496_v33, %s1568_s6  ;;  %s1574_s6 = smov 103  }
 0x36c   :  { %v879_v34 = vpop.permute.xlu1 %878 }
 0x36d   :  { %v881_v35 = vmul.f32 %v1494_v22, %v879_v34 }
 0x36f   :  { %889 = vrot.lane.b32.xlu0 %v881_v35, %s1569_s1  ;;  %s1174_s1 = sshll.u32 %s1576_s19, 4  ;;  %s1175_s1 = int_to_ptr.vmem [resolvable:$true] %s1174_s1 }
 0x370   :  { %s1521_s4 = scalar_lea.vmem %s1175_s1, 32  ;;  %p1526_p1 = scmp.lt.s32.totalorder %s1175_s1, %s1175_s1 }
 0x371   :  { %p1522_p0 = scmp.ne.s32.totalorder %s1175_s1, %s1521_s4  ;;  %p1527_p2 = scmp.lt.s32.totalorder %s1521_s4, %s1521_s4 }
 0x373   :  { %p1528_p3 = por %p1527_p2, %p1526_p1 }
 0x375   :  { %p1529_p4 = pnand %p1528_p3, %p1522_p0 }
 0x3e1   :  { %v890_v37 = vpop.permute.xlu0 %889 }
 0x3e2   :  { %1461 = vmatmul.mubr.msk.f32.vlgmr.msra.gmra.mxu0 %vm698_vm2, %v890_v37  ;;  %892 = vst.msk [vmem:[#allocation3] sm:$0x3] %vm886_vm3, %v890_v37 }
 0x3e3   :  { %1464 = vmatpush3.msra.mxu0 %v1084_v36  ;;  %1471 = vmatprep.mubr.msk.f32.mxu0 %vm1566_vm1, %v1565_v4 }
 0x3e4   :  { %1465 = vmatprep.subr.mxu0 %v1565_v4 }
 0x3e5   :  { %1466 = vmatpush3.msra.mxu0 %v1083_v38 }
 0x3e6   :  { %1467 = vmatprep.subr.mxu0 %v1565_v4 }
 0x3e7   :  { %1468 = vmatpush3.msra.mxu0 %v1082_v39 }
 0x3e8   :  { %1469 = vmatprep.subr.mxu0 %v1565_v4  ;;  %v1209_v4 = vld [vmem:[#allocation2] ss:$0 sm:$0xff] }
 0x3e9   :  { %1470 = vmatpush3.msra.mxu0 %v1081_v40 }
 0x3ea   :  { %1472 = vmatmul.mubr.msk.f32.vlgmr.msra.gmra.mxu0 %vm698_vm2, %v890_v37 }
 0x4a2   :  { %v972_v42 = vpop.f32.mrf.mxu0 }
 0x4a3   :  { %v2245_v43 = vadd.f32 %v1207_v41, %v972_v42 }
 0x4a4   :  { %v1462_v44 = vpop.f32.mrf.mxu0 }
 0x4a5   :  { %v1005_v45 = vsel %vm1004_vm4, %v2245_v43, -inf  ;;  %v989_v46 = vsel %vm988_vm5, %v2245_v43, -inf  ;;  %v1021_v47 = vsel %vm1020_vm6, %v2245_v43, -inf  ;;  %v1037_v48 = vsel %vm1036_vm7, %v2245_v43, -inf }
 0x4a6   :  { %1006 = vmax.xlane.f32.xlu0 %v1005_v45  ;;  %990 = vmax.xlane.f32.xlu1 %v989_v46  ;;  %v1053_v52 = vsel %vm1052_vm9, %v2245_v43, -inf  ;;  %v977_v53 = vsel %vm976_vm10, %v2245_v43, -inf }
 0x4aa   :  { %v1158_v49 = vpop.f32.mrf.mxu0  ;;  %1022 = vmax.xlane.f32.xlu0 %v1021_v47  ;;  %1038 = vmax.xlane.f32.xlu1 %v1037_v48 }
 0x4ab   :  { %v1159_v50 = vadd.f32 %v1209_v4, %v1158_v49 }
 0x4ac   :  { %v1473_v51 = vpop.f32.mrf.mxu0 }
 0x4ad   :  { %1163 = vst.msk [vmem:[%s2315_s15] sm:$0x3] %vm1162_vm8, %v1159_v50  ;;  %s1570_s15 = smov 118  }
 0x4ae   :  { %1054 = vmax.xlane.f32.xlu0 %v1053_v52  ;;  %978 = vmax.xlane.f32.xlu1 %v977_v53 }
 0x52f   :  { %v1007_v55 = vpop.xlane.xlu0 %1006  ;;  %v991_v56 = vpop.xlane.xlu1 %990 }
 0x530   :  { %v1008_v57 = vsub.f32 %v2245_v43, %v1007_v55  ;;  %v992_v58 = vsub.f32 %v2245_v43, %v991_v56 }
 0x532   :  { %v1009_v59 = vmul.f32 1.442695, %v1008_v57  ;;  %v993_v60 = vmul.f32 1.442695, %v992_v58 }
 0x533   :  { %v1023_v61 = vpop.xlane.xlu0 %1022  ;;  %v1039_v62 = vpop.xlane.xlu1 %1038 }
 0x534   :  { %1497 = vpow2.f32 %v1009_v59  ;;  %v1024_v63 = vsub.f32 %v2245_v43, %v1023_v61  ;;  %v1040_v0 = vsub.f32 %v2245_v43, %v1039_v62 }
 0x535   :  { %1499 = vpow2.f32 %v993_v60 }
 0x536   :  { %v1025_v1 = vmul.f32 1.442695, %v1024_v63  ;;  %v1041_v2 = vmul.f32 1.442695, %v1040_v0 }
 0x537   :  { %v1055_v3 = vpop.xlane.xlu0 %1054  ;;  %v979_v12 = vpop.xlane.xlu1 %978 }
 0x538   :  { %1501 = vpow2.f32 %v1025_v1  ;;  %v1056_v5 = vsub.f32 %v2245_v43, %v1055_v3  ;;  %v980_v13 = vsub.f32 %v2245_v43, %v979_v12 }
 0x539   :  { %1503 = vpow2.f32 %v1041_v2 }
 0x53a   :  { %v1057_v6 = vmul.f32 1.442695, %v1056_v5  ;;  %v981_v14 = vmul.f32 1.442695, %v980_v13 }
 0x53c   :  { %1505 = vpow2.f32 %v1057_v6 }
 0x53d   :  { %1507 = vpow2.f32 %v981_v14 }
 0x541   :  { %v2262_v7 = vpop.eup %1497 }
 0x542   :  { %v2264_v8 = vpop.eup %1499  ;;  %1012 = vrot.lane.b32.xlu1 %v2262_v7, %s1570_s15 }
 0x543   :  { %996 = vrot.lane.b32.xlu0 %v2264_v8, %s1571_s0 }
 0x545   :  { %v2268_v9 = vpop.eup %1501 }
 0x546   :  { %v2270_v10 = vpop.eup %1503  ;;  %1028 = vrot.lane.b32.xlu1 %v2268_v9, %s1572_s30 }
 0x547   :  { %1044 = vrot.lane.b32.xlu0 %v2270_v10, %s1573_s18 }
 0x549   :  { %v2274_v11 = vpop.eup %1505 }
 0x54a   :  { %1060 = vrot.lane.b32.xlu1 %v2274_v11, %s1574_s6  ;;  %v1508_v15 = vpop.eup %1507 }
 0x54b   :  { %883 = vrot.lane.b32.xlu0 %v2201_v28, %s1575_s13  ;;  %v983_v16 = vsel %vm976_vm10, %v1508_v15, 0.0 }
 0x56e   :  { %984 = vadd.xlane.f32.xlu1 %v983_v16 }
 0x5b4   :  { %v1013_v17 = vpop.permute.xlu1 %1012 }
 0x5b5   :  { %v997_v18 = vpop.permute.xlu0 %996  ;;  %v1015_v22 = vsel %vm976_vm10, %v1013_v17, 0.0 }
 0x5b6   :  { %v999_v19 = vsel %vm976_vm10, %v997_v18, 0.0 }
 0x5b7   :  { %1000 = vadd.xlane.f32.xlu0 %v999_v19 }
 0x5b8   :  { %v1029_v20 = vpop.permute.xlu1 %1028 }
 0x5b9   :  { %v1045_v54 = vpop.permute.xlu0 %1044  ;;  %v1031_v21 = vsel %vm976_vm10, %v1029_v20, 0.0 }
 0x5ba   :  { %1032 = vadd.xlane.f32.xlu1 %v1031_v21  ;;  %v1047_v26 = vsel %vm976_vm10, %v1045_v54, 0.0 }
 0x5bb   :  { %1016 = vadd.xlane.f32.xlu0 %v1015_v22 }
 0x5bc   :  { %v1061_v23 = vpop.permute.xlu1 %1060 }
 0x5bd   :  { %v884_v24 = vpop.permute.xlu0 %883  ;;  %v1063_v25 = vsel %vm976_vm10, %v1061_v23, 0.0 }
 0x5be   :  { %887 = vst.msk [vmem:[#allocation5] sm:$0x3] %vm886_vm3, %v884_v24  ;;  %1064 = vadd.xlane.f32.xlu1 %v1063_v25 }
 0x5bf   :  { %1048 = vadd.xlane.f32.xlu0 %v1047_v26 }
 0x5c0   :  { %1532 = shalt.err (!%p1529_p4)
}
 0x5c1   :  { %1177 = dma.vmem_to_hbm [thread:$0]  %s1175_s1, 32, %s2316_s16, [#allocation4]  }
 0x5c2   :  { %s1541_s22 = scalar_lea.vmem %s1185_s9, 32  ;;  %p1546_p6 = scmp.lt.s32.totalorder %s1185_s9, %s1185_s9 }
 0x5c3   :  { %p1542_p5 = scmp.ne.s32.totalorder %s1185_s9, %s1541_s22  ;;  %p1547_p7 = scmp.lt.s32.totalorder %s1541_s22, %s1541_s22 }
 0x5c5   :  { %p1548_p8 = por %p1547_p7, %p1546_p6 }
 0x5c7   :  { %p1549_p9 = pnand %p1548_p8, %p1542_p5 }
 0x5c9   :  { %1552 = shalt.err (!%p1549_p9)
}
 0x5ca   :  { %1187 = dma.vmem_to_hbm [thread:$0]  %s1185_s9, 32, %s2317_s17, [#allocation6]   ;;  %vm1068_vm11 = vcmask 39936   ;;  %vm1070_vm12 = vcmask 80896   ;;  %vm1072_vm13 = vcmask 121856   ;;  %vm1074_vm14 = vcmask 162816  }
 0x5cb   :  { %vm1076_vm15 = vcmask 203776   ;;  %vm1079_vm0 = vcmask 238592  }
 0x5f7   :  { %v985_v27 = vpop.xlane.xlu1 %984 }
 0x640   :  { %v1001_v28 = vpop.xlane.xlu0 %1000 }
 0x641   :  { %1509 = vrcp.f32 %v1001_v28 }
 0x642   :  { %1511 = vrcp.f32 %v985_v27 }
 0x643   :  { %v1033_v29 = vpop.xlane.xlu1 %1032 }
 0x644   :  { %v1017_v30 = vpop.xlane.xlu0 %1016  ;;  %1513 = vrcp.f32 %v1033_v29 }
 0x645   :  { %1515 = vrcp.f32 %v1017_v30 }
 0x647   :  { %v1065_v31 = vpop.xlane.xlu1 %1064 }
 0x648   :  { %v1049_v32 = vpop.xlane.xlu0 %1048  ;;  %1517 = vrcp.f32 %v1065_v31 }
 0x649   :  { %1519 = vrcp.f32 %v1049_v32 }
 0x64e   :  { %v1510_v33 = vpop.eup %1509 }
 0x64f   :  { %v1512_v34 = vpop.eup %1511  ;;  %v1003_v35 = vmul.f32 %v1510_v33, %v2264_v8 }
 0x650   :  { %v987_v38 = vmul.f32 %v1512_v34, %v1508_v15 }
 0x651   :  { %v1514_v36 = vpop.eup %1513 }
 0x652   :  { %v1516_v37 = vpop.eup %1515  ;;  %v1069_v40 = vsel %vm1068_vm11, %v987_v38, %v1003_v35  ;;  %v1035_v41 = vmul.f32 %v1514_v36, %v2268_v9 }
 0x653   :  { %v1019_v39 = vmul.f32 %v1516_v37, %v2262_v7 }
 0x655   :  { %v1518_v42 = vpop.eup %1517  ;;  %v1071_v43 = vsel %vm1070_vm12, %v1069_v40, %v1019_v39 }
 0x656   :  { %v1520_v44 = vpop.eup %1519  ;;  %v1067_v45 = vmul.f32 %v1518_v42, %v2274_v11  ;;  %v1073_v4 = vsel %vm1072_vm13, %v1071_v43, %v1035_v41 }
 0x657   :  { %v1051_v46 = vmul.f32 %v1520_v44, %v2270_v10 }
 0x659   :  { %v1075_v47 = vsel %vm1074_vm14, %v1073_v4, %v1051_v46 }
 0x65a   :  { %v1077_v48 = vsel %vm1076_vm15, %v1075_v47, %v1067_v45 }
 0x65b   :  { %v1078_v49 = vmin.f32 %v1077_v48, 1.0 }
 0x65d   :  { %1080 = vst.msk [vmem:[%s2314_s14] sm:$0x3] %vm1079_vm0, %v1078_v49 }
 0x65e   :  { %1561 = dma.done.wait [#allocation4], 32  }
 0x65f   :  { %1562 = vsyncadd [#allocation4], 4294967264 }
 0x660   :  { %1563 = dma.done.wait [#allocation6], 32  }
 0x661   :  { %1564 = vsyncadd [#allocation6], 4294967264 }
 0x662   :  { %1198 = vsyncpa [#allocation4], 1 }
 0x663   :  { %1199 = vsyncpa [#allocation6], 1 }

</bundles_post_ra>
